<compile_context>
chip_gen: v6e
topology: v6e:2x2x1
jax: 0.10.0
libtpu: 0.0.40
codegen_flags: <defaults>
</compile_context>

<pallas_src>
import functools

import jax
import jax.numpy as jnp
from jax.experimental import pallas as pl
from jax.experimental.pallas import tpu as pltpu

LEAKY_SLOPE = 0.2
BN_EPS = 1e-5

_TAPS = ((0, 0), (0, 1), (1, 0), (1, 1))


# ----------------------------------------------------------------------------
# Pallas kernel: fused conv(4,2,1) [+ folded BN] + LeakyReLU for one batch item
# ----------------------------------------------------------------------------
def _conv_s2d_kernel(x_ref, w_ref, shift_ref, o_ref, *, m, ws):
    # x_ref:     (1, rows, 4*Cin) bf16  flattened space-to-depth activation
    # w_ref:     (4, 4*Cin, Cout) bf16  conv weight per 2x2 tap (BN scale folded)
    # shift_ref: (1, Cout)        f32   folded bias + BN shift
    # o_ref:     (1, m, Cout)     bf16  m = OH * Ws rows (Ws = OW+1, last col garbage)
    cout = shift_ref.shape[-1]
    acc = jnp.zeros((m, cout), jnp.float32)
    for idx, (dy, dx) in enumerate(_TAPS):
        tap = x_ref[0, pl.ds(dy * ws + dx, m), :]          # contiguous, no stride
        acc = acc + jnp.dot(tap, w_ref[idx], preferred_element_type=jnp.float32)
    y = acc + shift_ref[...]
    y = jnp.where(y > 0, y, LEAKY_SLOPE * y)
    o_ref[0] = y.astype(o_ref.dtype)


def _conv_layer_pallas(xs_flat, w4, shift, *, m, ws):
    n, rows, c4 = xs_flat.shape
    cout = w4.shape[-1]

    cost = pl.CostEstimate(
        flops=2 * n * 4 * m * c4 * cout,
        transcendentals=0,
        bytes_accessed=(xs_flat.size * 2 + w4.size * 2 + shift.size * 4
                        + n * m * cout * 2),
    )

    return pl.pallas_call(
        functools.partial(_conv_s2d_kernel, m=m, ws=ws),
        out_shape=jax.ShapeDtypeStruct((n, m, cout), jnp.bfloat16),
        grid_spec=pltpu.PrefetchScalarGridSpec(
            num_scalar_prefetch=0,
            grid=(n,),
            in_specs=[
                pl.BlockSpec((1, rows, c4), lambda b: (b, 0, 0)),
                pl.BlockSpec((4, c4, cout), lambda b: (0, 0, 0)),   # VMEM resident
                pl.BlockSpec((1, cout), lambda b: (0, 0)),
            ],
            out_specs=pl.BlockSpec((1, m, cout), lambda b: (b, 0, 0)),
        ),
        compiler_params=pltpu.CompilerParams(
            dimension_semantics=("parallel",),          # batch -> 2 TCs on v7x
            vmem_limit_bytes=32 * 1024 * 1024,          # safe on v7x's 64 MiB VMEM
        ),
        cost_estimate=cost,
    )(xs_flat, w4, shift)


# ----------------------------------------------------------------------------
# Plain-JAX glue (activation-sized, no 16x im2col inflation)
# ----------------------------------------------------------------------------
def _space_to_depth_pad(x_nhwc):
    """pad=1, 2x2 space-to-depth, flatten rows; one extra zero row so every tap of
    the equivalent 2x2 stride-1 conv is a contiguous length-(OH*Ws) slice."""
    n, h, w, c = x_nhwc.shape
    oh, ow = h // 2, w // 2
    hs, ws = oh + 1, ow + 1
    xp = jnp.pad(x_nhwc, ((0, 0), (1, 1), (1, 1), (0, 0)))
    xs = xp.reshape(n, hs, 2, ws, 2, c)
    xs = jnp.transpose(xs, (0, 1, 3, 2, 4, 5))          # (n, hs, ws, py, px, c)
    xs = xs.reshape(n, hs * ws, 4 * c)
    xs = jnp.pad(xs, ((0, 0), (0, 1), (0, 0)))          # overrun row for tap (1,1)
    return xs, (oh, ow, ws)


def _fold_bn_params(w_oihw, bias, bn_params):
    """Fold eval-mode BN into per-channel scale (into weights, bf16) and f32 shift."""
    cout = w_oihw.shape[0]
    if bn_params is None:
        scale = jnp.ones((cout,), jnp.float32)
        shift = bias.astype(jnp.float32)
    else:
        gamma, beta, mean, var = bn_params
        scale = gamma / jnp.sqrt(var + BN_EPS)
        shift = (bias - mean) * scale + beta
    w_folded = (w_oihw.astype(jnp.float32) * scale[:, None, None, None]).astype(jnp.bfloat16)
    return w_folded, shift.astype(jnp.float32)


def _weight_to_s2d(w_folded_oihw):
    """(Cout, Cin, 4, 4) -> (4 taps, 4*Cin, Cout) matching the s2d channel order."""
    cout, cin = w_folded_oihw.shape[:2]
    w_r = w_folded_oihw.reshape(cout, cin, 2, 2, 2, 2)   # (o, c, dy, py, dx, px)
    w4 = jnp.transpose(w_r, (2, 4, 3, 5, 1, 0))          # (dy, dx, py, px, c, o)
    return w4.reshape(4, 4 * cin, cout)


def _conv_layer(x_nhwc, w_oihw, bias, bn_params):
    n, h, w, cin = x_nhwc.shape
    cout = w_oihw.shape[0]
    oh, ow = h // 2, w // 2
    ws = ow + 1
    m = oh * ws                                          # includes 1 garbage col/row

    w_folded, shift = _fold_bn_params(w_oihw, bias, bn_params)
    w4 = _weight_to_s2d(w_folded)
    shift = shift.reshape(1, cout)

    xs_flat, _ = _space_to_depth_pad(x_nhwc)
    out = _conv_layer_pallas(xs_flat, w4, shift, m=m, ws=ws)
    out = out.reshape(n, oh, ws, cout)[:, :, :ow, :]     # drop the garbage column
    return out                                           # (n, oh, ow, cout) bf16


# ----------------------------------------------------------------------------
# Parameter init (deterministic, synthetic)
# ----------------------------------------------------------------------------
def init_encoder_params(key, input_channel):
    chans = [(input_channel, 32), (32, 64), (64, 128), (128, 256)]
    params = []
    for li, (cin, cout) in enumerate(chans):
        key, kw, kb, kg, kbe, km, kv = jax.random.split(key, 7)
        w = 0.05 * jax.random.normal(kw, (cout, cin, 4, 4), jnp.float32)
        b = 0.01 * jax.random.normal(kb, (cout,), jnp.float32)
        if li == 0:
            params.append({"w": w, "b": b, "bn": None})
        else:
            gamma = 1.0 + 0.1 * jax.random.normal(kg, (cout,), jnp.float32)
            beta = 0.1 * jax.random.normal(kbe, (cout,), jnp.float32)
            mean = 0.05 * jax.random.normal(km, (cout,), jnp.float32)
            var = 1.0 + 0.1 * jax.random.uniform(kv, (cout,), jnp.float32)
            params.append({"w": w, "b": b, "bn": (gamma, beta, mean, var)})
    return params


# ----------------------------------------------------------------------------
# Encoder forward (NCHW in / NCHW out, like the PyTorch module)
# ----------------------------------------------------------------------------
@jax.jit
def encoder_forward(params, x_nchw):
    x = jnp.transpose(x_nchw, (0, 2, 3, 1)).astype(jnp.bfloat16)   # NCHW -> NHWC bf16
    feats = []
    for p in params:
        x = _conv_layer(x, p["w"], p["b"], p["bn"])
        feats.append(x)
    # back to NCHW / f32 only for the returned features
    return tuple(jnp.transpose(f, (0, 3, 1, 2)).astype(jnp.float32) for f in feats)


# ----------------------------------------------------------------------------
# Pure-XLA reference (same bf16 casts / folded BN) for a correctness check
# ----------------------------------------------------------------------------
@jax.jit
def _ref_forward(params, x_nchw):
    x = jnp.transpose(x_nchw, (0, 2, 3, 1)).astype(jnp.bfloat16)
    feats = []
    for p in params:
        w_folded, shift = _fold_bn_params(p["w"], p["b"], p["bn"])
        y = jax.lax.conv_general_dilated(
            x, jnp.transpose(w_folded, (2, 3, 1, 0)),
            window_strides=(2, 2), padding=((1, 1), (1, 1)),
            dimension_numbers=("NHWC", "HWIO", "NHWC"),
            preferred_element_type=jnp.float32)
        y = y + shift[None, None, None, :]
        y = jnp.where(y > 0, y, LEAKY_SLOPE * y)
        x = y.astype(jnp.bfloat16)
        feats.append(x)
    return tuple(jnp.transpose(f, (0, 3, 1, 2)).astype(jnp.float32) for f in feats)


if __name__ == "__main__":
    key = jax.random.PRNGKey(0)
    kx, kp = jax.random.split(key)

    # opt.input_channel = 4; spatial 16 -> outputs 8, 4, 2, 1
    x = jax.random.normal(kx, (2, 4, 16, 16), jnp.float32)
    params = init_encoder_params(kp, input_channel=4)

    feats = encoder_forward(params, x)
    jax.block_until_ready(feats)
    enco1, enco2, enco3, codex = feats

    assert enco1.shape == (2, 32, 8, 8)
    assert enco2.shape == (2, 64, 4, 4)
    assert enco3.shape == (2, 128, 2, 2)
    assert codex.shape == (2, 256, 1, 1)
    assert all(bool(jnp.isfinite(f).all()) for f in feats)

    ref = _ref_forward(params, x)
    for got, want in zip(feats, ref):
        err = float(jnp.max(jnp.abs(got - want)))
        assert err < 2e-2, f"mismatch vs XLA conv reference: max abs err {err}"

    print("KERNEL_OK")
</pallas_src>

<mosaic_0001>
module attributes {stable_mosaic.version = 11 : i64} {
  func.func @_conv_s2d_kernel(%arg0: i32, %arg1: memref<1x82x16xbf16, #tpu.memory_space<vmem>>, %arg2: memref<4x16x32xbf16, #tpu.memory_space<vmem>>, %arg3: memref<1x32xf32, #tpu.memory_space<vmem>>, %arg4: memref<1x72x32xbf16, #tpu.memory_space<vmem>>) attributes {dimension_semantics = [#tpu.dimension_semantics<parallel>], iteration_bounds = array<i64: 2>, scalar_prefetch = 0 : i64, scratch_operands = 0 : i64, tpu.core_type = #tpu.core_type<tc>, window_params = [{transform_indices = @transform_0, window_bounds = array<i64: 1, 82, 16>}, {pipeline_mode = #tpu.pipeline_mode<synchronous>, transform_indices = @transform_1, window_bounds = array<i64: 4, 16, 32>}, {pipeline_mode = #tpu.pipeline_mode<synchronous>, transform_indices = @transform_2, window_bounds = array<i64: 1, 32>}, {transform_indices = @transform_3, window_bounds = array<i64: 1, 72, 32>}]} {
    %cst = arith.constant 0.000000e+00 : f32
    %0 = vector.broadcast %cst : f32 to vector<72x32xf32>
    %c0 = arith.constant 0 : index
    %c0_0 = arith.constant 0 : index
    %c0_1 = arith.constant 0 : index
    %1 = vector.load %arg1[%c0, %c0_0, %c0_1] : memref<1x82x16xbf16, #tpu.memory_space<vmem>>, vector<1x72x16xbf16>
    %2 = vector.shape_cast %1 : vector<1x72x16xbf16> to vector<72x16xbf16>
    %c0_2 = arith.constant 0 : index
    %c0_3 = arith.constant 0 : index
    %c0_4 = arith.constant 0 : index
    %3 = vector.load %arg2[%c0_2, %c0_3, %c0_4] : memref<4x16x32xbf16, #tpu.memory_space<vmem>>, vector<1x16x32xbf16>
    %4 = vector.shape_cast %3 : vector<1x16x32xbf16> to vector<16x32xbf16>
    %cst_5 = arith.constant dense<0.000000e+00> : vector<72x32xf32>
    %5 = tpu.matmul %2, %4, %cst_5 {dimension_numbers = #tpu.dot_dimension_numbers<[1], [0], [0], [1], [0, 0, 1, 1], [], []>} : vector<72x16xbf16>, vector<16x32xbf16>, vector<72x32xf32> -> vector<72x32xf32>
    %6 = arith.addf %0, %5 : vector<72x32xf32>
    %c0_6 = arith.constant 0 : index
    %c1 = arith.constant 1 : index
    %c0_7 = arith.constant 0 : index
    %7 = vector.load %arg1[%c0_6, %c1, %c0_7] : memref<1x82x16xbf16, #tpu.memory_space<vmem>>, vector<1x72x16xbf16>
    %8 = vector.shape_cast %7 : vector<1x72x16xbf16> to vector<72x16xbf16>
    %c1_8 = arith.constant 1 : index
    %c0_9 = arith.constant 0 : index
    %c0_10 = arith.constant 0 : index
    %9 = vector.load %arg2[%c1_8, %c0_9, %c0_10] : memref<4x16x32xbf16, #tpu.memory_space<vmem>>, vector<1x16x32xbf16>
    %10 = vector.shape_cast %9 : vector<1x16x32xbf16> to vector<16x32xbf16>
    %cst_11 = arith.constant dense<0.000000e+00> : vector<72x32xf32>
    %11 = tpu.matmul %8, %10, %cst_11 {dimension_numbers = #tpu.dot_dimension_numbers<[1], [0], [0], [1], [0, 0, 1, 1], [], []>} : vector<72x16xbf16>, vector<16x32xbf16>, vector<72x32xf32> -> vector<72x32xf32>
    %12 = arith.addf %6, %11 : vector<72x32xf32>
    %c0_12 = arith.constant 0 : index
    %c9 = arith.constant 9 : index
    %c0_13 = arith.constant 0 : index
    %13 = vector.load %arg1[%c0_12, %c9, %c0_13] : memref<1x82x16xbf16, #tpu.memory_space<vmem>>, vector<1x72x16xbf16>
    %14 = vector.shape_cast %13 : vector<1x72x16xbf16> to vector<72x16xbf16>
    %c2 = arith.constant 2 : index
    %c0_14 = arith.constant 0 : index
    %c0_15 = arith.constant 0 : index
    %15 = vector.load %arg2[%c2, %c0_14, %c0_15] : memref<4x16x32xbf16, #tpu.memory_space<vmem>>, vector<1x16x32xbf16>
    %16 = vector.shape_cast %15 : vector<1x16x32xbf16> to vector<16x32xbf16>
    %cst_16 = arith.constant dense<0.000000e+00> : vector<72x32xf32>
    %17 = tpu.matmul %14, %16, %cst_16 {dimension_numbers = #tpu.dot_dimension_numbers<[1], [0], [0], [1], [0, 0, 1, 1], [], []>} : vector<72x16xbf16>, vector<16x32xbf16>, vector<72x32xf32> -> vector<72x32xf32>
    %18 = arith.addf %12, %17 : vector<72x32xf32>
    %c0_17 = arith.constant 0 : index
    %c10 = arith.constant 10 : index
    %c0_18 = arith.constant 0 : index
    %19 = vector.load %arg1[%c0_17, %c10, %c0_18] : memref<1x82x16xbf16, #tpu.memory_space<vmem>>, vector<1x72x16xbf16>
    %20 = vector.shape_cast %19 : vector<1x72x16xbf16> to vector<72x16xbf16>
    %c3 = arith.constant 3 : index
    %c0_19 = arith.constant 0 : index
    %c0_20 = arith.constant 0 : index
    %21 = vector.load %arg2[%c3, %c0_19, %c0_20] : memref<4x16x32xbf16, #tpu.memory_space<vmem>>, vector<1x16x32xbf16>
    %22 = vector.shape_cast %21 : vector<1x16x32xbf16> to vector<16x32xbf16>
    %cst_21 = arith.constant dense<0.000000e+00> : vector<72x32xf32>
    %23 = tpu.matmul %20, %22, %cst_21 {dimension_numbers = #tpu.dot_dimension_numbers<[1], [0], [0], [1], [0, 0, 1, 1], [], []>} : vector<72x16xbf16>, vector<16x32xbf16>, vector<72x32xf32> -> vector<72x32xf32>
    %24 = arith.addf %18, %23 : vector<72x32xf32>
    %c0_22 = arith.constant 0 : index
    %c0_23 = arith.constant 0 : index
    %25 = vector.load %arg3[%c0_22, %c0_23] : memref<1x32xf32, #tpu.memory_space<vmem>>, vector<1x32xf32>
    %26 = vector.broadcast %25 : vector<1x32xf32> to vector<72x32xf32>
    %27 = arith.addf %24, %26 : vector<72x32xf32>
    %cst_24 = arith.constant 0.000000e+00 : f32
    %28 = vector.broadcast %cst_24 : f32 to vector<72x32xf32>
    %29 = arith.cmpf ogt, %27, %28 : vector<72x32xf32>
    %cst_25 = arith.constant 2.000000e-01 : f32
    %30 = vector.broadcast %cst_25 : f32 to vector<72x32xf32>
    %31 = arith.mulf %30, %27 : vector<72x32xf32>
    %32 = arith.select %29, %27, %31 : vector<72x32xi1>, vector<72x32xf32>
    %33 = arith.truncf %32 : vector<72x32xf32> to vector<72x32xbf16>
    %c0_26 = arith.constant 0 : index
    %c0_27 = arith.constant 0 : index
    %c0_28 = arith.constant 0 : index
    %34 = vector.load %arg4[%c0_26, %c0_27, %c0_28] : memref<1x72x32xbf16, #tpu.memory_space<vmem>>, vector<1x72x32xbf16>
    %35 = vector.shape_cast %34 : vector<1x72x32xbf16> to vector<72x32xbf16>
    %36 = vector.shape_cast %33 : vector<72x32xbf16> to vector<1x72x32xbf16>
    tpu.vector_store %arg4[%c0_26, %c0_27, %c0_28], %36 {strides = array<i32>} : memref<1x72x32xbf16, #tpu.memory_space<vmem>>, vector<1x72x32xbf16>,
    return
  }
  func.func @transform_0(%arg0: i32) -> (i32, i32, i32) {
    %c0_i32 = arith.constant 0 : i32
    %c0_i32_0 = arith.constant 0 : i32
    %c0_i32_1 = arith.constant 0 : i32
    return %arg0, %c0_i32, %c0_i32_0 : i32, i32, i32
  }
  func.func @transform_1(%arg0: i32) -> (i32, i32, i32) {
    %c0_i32 = arith.constant 0 : i32
    %c0_i32_0 = arith.constant 0 : i32
    %c0_i32_1 = arith.constant 0 : i32
    %c0_i32_2 = arith.constant 0 : i32
    return %c0_i32, %c0_i32_0, %c0_i32_1 : i32, i32, i32
  }
  func.func @transform_2(%arg0: i32) -> (i32, i32) {
    %c0_i32 = arith.constant 0 : i32
    %c0_i32_0 = arith.constant 0 : i32
    %c0_i32_1 = arith.constant 0 : i32
    return %c0_i32, %c0_i32_0 : i32, i32
  }
  func.func @transform_3(%arg0: i32) -> (i32, i32, i32) {
    %c0_i32 = arith.constant 0 : i32
    %c0_i32_0 = arith.constant 0 : i32
    %c0_i32_1 = arith.constant 0 : i32
    return %arg0, %c0_i32, %c0_i32_0 : i32, i32, i32
  }
}

module attributes {stable_mosaic.version = 11 : i64} {
  func.func @_conv_s2d_kernel(%arg0: i32, %arg1: memref<1x26x128xbf16, #tpu.memory_space<vmem>>, %arg2: memref<4x128x64xbf16, #tpu.memory_space<vmem>>, %arg3: memref<1x64xf32, #tpu.memory_space<vmem>>, %arg4: memref<1x20x64xbf16, #tpu.memory_space<vmem>>) attributes {dimension_semantics = [#tpu.dimension_semantics<parallel>], iteration_bounds = array<i64: 2>, scalar_prefetch = 0 : i64, scratch_operands = 0 : i64, tpu.core_type = #tpu.core_type<tc>, window_params = [{transform_indices = @transform_0, window_bounds = array<i64: 1, 26, 128>}, {pipeline_mode = #tpu.pipeline_mode<synchronous>, transform_indices = @transform_1, window_bounds = array<i64: 4, 128, 64>}, {pipeline_mode = #tpu.pipeline_mode<synchronous>, transform_indices = @transform_2, window_bounds = array<i64: 1, 64>}, {transform_indices = @transform_3, window_bounds = array<i64: 1, 20, 64>}]} {
    %cst = arith.constant 0.000000e+00 : f32
    %0 = vector.broadcast %cst : f32 to vector<20x64xf32>
    %c0 = arith.constant 0 : index
    %c0_0 = arith.constant 0 : index
    %c0_1 = arith.constant 0 : index
    %1 = vector.load %arg1[%c0, %c0_0, %c0_1] : memref<1x26x128xbf16, #tpu.memory_space<vmem>>, vector<1x20x128xbf16>
    %2 = vector.shape_cast %1 : vector<1x20x128xbf16> to vector<20x128xbf16>
    %c0_2 = arith.constant 0 : index
    %c0_3 = arith.constant 0 : index
    %c0_4 = arith.constant 0 : index
    %3 = vector.load %arg2[%c0_2, %c0_3, %c0_4] : memref<4x128x64xbf16, #tpu.memory_space<vmem>>, vector<1x128x64xbf16>
    %4 = vector.shape_cast %3 : vector<1x128x64xbf16> to vector<128x64xbf16>
    %cst_5 = arith.constant dense<0.000000e+00> : vector<20x64xf32>
    %5 = tpu.matmul %2, %4, %cst_5 {dimension_numbers = #tpu.dot_dimension_numbers<[1], [0], [0], [1], [0, 0, 1, 1], [], []>} : vector<20x128xbf16>, vector<128x64xbf16>, vector<20x64xf32> -> vector<20x64xf32>
    %6 = arith.addf %0, %5 : vector<20x64xf32>
    %c0_6 = arith.constant 0 : index
    %c1 = arith.constant 1 : index
    %c0_7 = arith.constant 0 : index
    %7 = vector.load %arg1[%c0_6, %c1, %c0_7] : memref<1x26x128xbf16, #tpu.memory_space<vmem>>, vector<1x20x128xbf16>
    %8 = vector.shape_cast %7 : vector<1x20x128xbf16> to vector<20x128xbf16>
    %c1_8 = arith.constant 1 : index
    %c0_9 = arith.constant 0 : index
    %c0_10 = arith.constant 0 : index
    %9 = vector.load %arg2[%c1_8, %c0_9, %c0_10] : memref<4x128x64xbf16, #tpu.memory_space<vmem>>, vector<1x128x64xbf16>
    %10 = vector.shape_cast %9 : vector<1x128x64xbf16> to vector<128x64xbf16>
    %cst_11 = arith.constant dense<0.000000e+00> : vector<20x64xf32>
    %11 = tpu.matmul %8, %10, %cst_11 {dimension_numbers = #tpu.dot_dimension_numbers<[1], [0], [0], [1], [0, 0, 1, 1], [], []>} : vector<20x128xbf16>, vector<128x64xbf16>, vector<20x64xf32> -> vector<20x64xf32>
    %12 = arith.addf %6, %11 : vector<20x64xf32>
    %c0_12 = arith.constant 0 : index
    %c5 = arith.constant 5 : index
    %c0_13 = arith.constant 0 : index
    %13 = vector.load %arg1[%c0_12, %c5, %c0_13] : memref<1x26x128xbf16, #tpu.memory_space<vmem>>, vector<1x20x128xbf16>
    %14 = vector.shape_cast %13 : vector<1x20x128xbf16> to vector<20x128xbf16>
    %c2 = arith.constant 2 : index
    %c0_14 = arith.constant 0 : index
    %c0_15 = arith.constant 0 : index
    %15 = vector.load %arg2[%c2, %c0_14, %c0_15] : memref<4x128x64xbf16, #tpu.memory_space<vmem>>, vector<1x128x64xbf16>
    %16 = vector.shape_cast %15 : vector<1x128x64xbf16> to vector<128x64xbf16>
    %cst_16 = arith.constant dense<0.000000e+00> : vector<20x64xf32>
    %17 = tpu.matmul %14, %16, %cst_16 {dimension_numbers = #tpu.dot_dimension_numbers<[1], [0], [0], [1], [0, 0, 1, 1], [], []>} : vector<20x128xbf16>, vector<128x64xbf16>, vector<20x64xf32> -> vector<20x64xf32>
    %18 = arith.addf %12, %17 : vector<20x64xf32>
    %c0_17 = arith.constant 0 : index
    %c6 = arith.constant 6 : index
    %c0_18 = arith.constant 0 : index
    %19 = vector.load %arg1[%c0_17, %c6, %c0_18] : memref<1x26x128xbf16, #tpu.memory_space<vmem>>, vector<1x20x128xbf16>
    %20 = vector.shape_cast %19 : vector<1x20x128xbf16> to vector<20x128xbf16>
    %c3 = arith.constant 3 : index
    %c0_19 = arith.constant 0 : index
    %c0_20 = arith.constant 0 : index
    %21 = vector.load %arg2[%c3, %c0_19, %c0_20] : memref<4x128x64xbf16, #tpu.memory_space<vmem>>, vector<1x128x64xbf16>
    %22 = vector.shape_cast %21 : vector<1x128x64xbf16> to vector<128x64xbf16>
    %cst_21 = arith.constant dense<0.000000e+00> : vector<20x64xf32>
    %23 = tpu.matmul %20, %22, %cst_21 {dimension_numbers = #tpu.dot_dimension_numbers<[1], [0], [0], [1], [0, 0, 1, 1], [], []>} : vector<20x128xbf16>, vector<128x64xbf16>, vector<20x64xf32> -> vector<20x64xf32>
    %24 = arith.addf %18, %23 : vector<20x64xf32>
    %c0_22 = arith.constant 0 : index
    %c0_23 = arith.constant 0 : index
    %25 = vector.load %arg3[%c0_22, %c0_23] : memref<1x64xf32, #tpu.memory_space<vmem>>, vector<1x64xf32>
    %26 = vector.broadcast %25 : vector<1x64xf32> to vector<20x64xf32>
    %27 = arith.addf %24, %26 : vector<20x64xf32>
    %cst_24 = arith.constant 0.000000e+00 : f32
    %28 = vector.broadcast %cst_24 : f32 to vector<20x64xf32>
    %29 = arith.cmpf ogt, %27, %28 : vector<20x64xf32>
    %cst_25 = arith.constant 2.000000e-01 : f32
    %30 = vector.broadcast %cst_25 : f32 to vector<20x64xf32>
    %31 = arith.mulf %30, %27 : vector<20x64xf32>
    %32 = arith.select %29, %27, %31 : vector<20x64xi1>, vector<20x64xf32>
    %33 = arith.truncf %32 : vector<20x64xf32> to vector<20x64xbf16>
    %c0_26 = arith.constant 0 : index
    %c0_27 = arith.constant 0 : index
    %c0_28 = arith.constant 0 : index
    %34 = vector.load %arg4[%c0_26, %c0_27, %c0_28] : memref<1x20x64xbf16, #tpu.memory_space<vmem>>, vector<1x20x64xbf16>
    %35 = vector.shape_cast %34 : vector<1x20x64xbf16> to vector<20x64xbf16>
    %36 = vector.shape_cast %33 : vector<20x64xbf16> to vector<1x20x64xbf16>
    tpu.vector_store %arg4[%c0_26, %c0_27, %c0_28], %36 {strides = array<i32>} : memref<1x20x64xbf16, #tpu.memory_space<vmem>>, vector<1x20x64xbf16>,
    return
  }
  func.func @transform_0(%arg0: i32) -> (i32, i32, i32) {
    %c0_i32 = arith.constant 0 : i32
    %c0_i32_0 = arith.constant 0 : i32
    %c0_i32_1 = arith.constant 0 : i32
    return %arg0, %c0_i32, %c0_i32_0 : i32, i32, i32
  }
  func.func @transform_1(%arg0: i32) -> (i32, i32, i32) {
    %c0_i32 = arith.constant 0 : i32
    %c0_i32_0 = arith.constant 0 : i32
    %c0_i32_1 = arith.constant 0 : i32
    %c0_i32_2 = arith.constant 0 : i32
    return %c0_i32, %c0_i32_0, %c0_i32_1 : i32, i32, i32
  }
  func.func @transform_2(%arg0: i32) -> (i32, i32) {
    %c0_i32 = arith.constant 0 : i32
    %c0_i32_0 = arith.constant 0 : i32
    %c0_i32_1 = arith.constant 0 : i32
    return %c0_i32, %c0_i32_0 : i32, i32
  }
  func.func @transform_3(%arg0: i32) -> (i32, i32, i32) {
    %c0_i32 = arith.constant 0 : i32
    %c0_i32_0 = arith.constant 0 : i32
    %c0_i32_1 = arith.constant 0 : i32
    return %arg0, %c0_i32, %c0_i32_0 : i32, i32, i32
  }
}

module attributes {stable_mosaic.version = 11 : i64} {
  func.func @_conv_s2d_kernel(%arg0: i32, %arg1: memref<1x10x256xbf16, #tpu.memory_space<vmem>>, %arg2: memref<4x256x128xbf16, #tpu.memory_space<vmem>>, %arg3: memref<1x128xf32, #tpu.memory_space<vmem>>, %arg4: memref<1x6x128xbf16, #tpu.memory_space<vmem>>) attributes {dimension_semantics = [#tpu.dimension_semantics<parallel>], iteration_bounds = array<i64: 2>, scalar_prefetch = 0 : i64, scratch_operands = 0 : i64, tpu.core_type = #tpu.core_type<tc>, window_params = [{transform_indices = @transform_0, window_bounds = array<i64: 1, 10, 256>}, {pipeline_mode = #tpu.pipeline_mode<synchronous>, transform_indices = @transform_1, window_bounds = array<i64: 4, 256, 128>}, {pipeline_mode = #tpu.pipeline_mode<synchronous>, transform_indices = @transform_2, window_bounds = array<i64: 1, 128>}, {transform_indices = @transform_3, window_bounds = array<i64: 1, 6, 128>}]} {
    %cst = arith.constant 0.000000e+00 : f32
    %0 = vector.broadcast %cst : f32 to vector<6x128xf32>
    %c0 = arith.constant 0 : index
    %c0_0 = arith.constant 0 : index
    %c0_1 = arith.constant 0 : index
    %1 = vector.load %arg1[%c0, %c0_0, %c0_1] : memref<1x10x256xbf16, #tpu.memory_space<vmem>>, vector<1x6x256xbf16>
    %2 = vector.shape_cast %1 : vector<1x6x256xbf16> to vector<6x256xbf16>
    %c0_2 = arith.constant 0 : index
    %c0_3 = arith.constant 0 : index
    %c0_4 = arith.constant 0 : index
    %3 = vector.load %arg2[%c0_2, %c0_3, %c0_4] : memref<4x256x128xbf16, #tpu.memory_space<vmem>>, vector<1x256x128xbf16>
    %4 = vector.shape_cast %3 : vector<1x256x128xbf16> to vector<256x128xbf16>
    %cst_5 = arith.constant dense<0.000000e+00> : vector<6x128xf32>
    %5 = tpu.matmul %2, %4, %cst_5 {dimension_numbers = #tpu.dot_dimension_numbers<[1], [0], [0], [1], [0, 0, 1, 1], [], []>} : vector<6x256xbf16>, vector<256x128xbf16>, vector<6x128xf32> -> vector<6x128xf32>
    %6 = arith.addf %0, %5 : vector<6x128xf32>
    %c0_6 = arith.constant 0 : index
    %c1 = arith.constant 1 : index
    %c0_7 = arith.constant 0 : index
    %7 = vector.load %arg1[%c0_6, %c1, %c0_7] : memref<1x10x256xbf16, #tpu.memory_space<vmem>>, vector<1x6x256xbf16>
    %8 = vector.shape_cast %7 : vector<1x6x256xbf16> to vector<6x256xbf16>
    %c1_8 = arith.constant 1 : index
    %c0_9 = arith.constant 0 : index
    %c0_10 = arith.constant 0 : index
    %9 = vector.load %arg2[%c1_8, %c0_9, %c0_10] : memref<4x256x128xbf16, #tpu.memory_space<vmem>>, vector<1x256x128xbf16>
    %10 = vector.shape_cast %9 : vector<1x256x128xbf16> to vector<256x128xbf16>
    %cst_11 = arith.constant dense<0.000000e+00> : vector<6x128xf32>
    %11 = tpu.matmul %8, %10, %cst_11 {dimension_numbers = #tpu.dot_dimension_numbers<[1], [0], [0], [1], [0, 0, 1, 1], [], []>} : vector<6x256xbf16>, vector<256x128xbf16>, vector<6x128xf32> -> vector<6x128xf32>
    %12 = arith.addf %6, %11 : vector<6x128xf32>
    %c0_12 = arith.constant 0 : index
    %c3 = arith.constant 3 : index
    %c0_13 = arith.constant 0 : index
    %13 = vector.load %arg1[%c0_12, %c3, %c0_13] : memref<1x10x256xbf16, #tpu.memory_space<vmem>>, vector<1x6x256xbf16>
    %14 = vector.shape_cast %13 : vector<1x6x256xbf16> to vector<6x256xbf16>
    %c2 = arith.constant 2 : index
    %c0_14 = arith.constant 0 : index
    %c0_15 = arith.constant 0 : index
    %15 = vector.load %arg2[%c2, %c0_14, %c0_15] : memref<4x256x128xbf16, #tpu.memory_space<vmem>>, vector<1x256x128xbf16>
    %16 = vector.shape_cast %15 : vector<1x256x128xbf16> to vector<256x128xbf16>
    %cst_16 = arith.constant dense<0.000000e+00> : vector<6x128xf32>
    %17 = tpu.matmul %14, %16, %cst_16 {dimension_numbers = #tpu.dot_dimension_numbers<[1], [0], [0], [1], [0, 0, 1, 1], [], []>} : vector<6x256xbf16>, vector<256x128xbf16>, vector<6x128xf32> -> vector<6x128xf32>
    %18 = arith.addf %12, %17 : vector<6x128xf32>
    %c0_17 = arith.constant 0 : index
    %c4 = arith.constant 4 : index
    %c0_18 = arith.constant 0 : index
    %19 = vector.load %arg1[%c0_17, %c4, %c0_18] : memref<1x10x256xbf16, #tpu.memory_space<vmem>>, vector<1x6x256xbf16>
    %20 = vector.shape_cast %19 : vector<1x6x256xbf16> to vector<6x256xbf16>
    %c3_19 = arith.constant 3 : index
    %c0_20 = arith.constant 0 : index
    %c0_21 = arith.constant 0 : index
    %21 = vector.load %arg2[%c3_19, %c0_20, %c0_21] : memref<4x256x128xbf16, #tpu.memory_space<vmem>>, vector<1x256x128xbf16>
    %22 = vector.shape_cast %21 : vector<1x256x128xbf16> to vector<256x128xbf16>
    %cst_22 = arith.constant dense<0.000000e+00> : vector<6x128xf32>
    %23 = tpu.matmul %20, %22, %cst_22 {dimension_numbers = #tpu.dot_dimension_numbers<[1], [0], [0], [1], [0, 0, 1, 1], [], []>} : vector<6x256xbf16>, vector<256x128xbf16>, vector<6x128xf32> -> vector<6x128xf32>
    %24 = arith.addf %18, %23 : vector<6x128xf32>
    %c0_23 = arith.constant 0 : index
    %c0_24 = arith.constant 0 : index
    %25 = vector.load %arg3[%c0_23, %c0_24] : memref<1x128xf32, #tpu.memory_space<vmem>>, vector<1x128xf32>
    %26 = vector.broadcast %25 : vector<1x128xf32> to vector<6x128xf32>
    %27 = arith.addf %24, %26 : vector<6x128xf32>
    %cst_25 = arith.constant 0.000000e+00 : f32
    %28 = vector.broadcast %cst_25 : f32 to vector<6x128xf32>
    %29 = arith.cmpf ogt, %27, %28 : vector<6x128xf32>
    %cst_26 = arith.constant 2.000000e-01 : f32
    %30 = vector.broadcast %cst_26 : f32 to vector<6x128xf32>
    %31 = arith.mulf %30, %27 : vector<6x128xf32>
    %32 = arith.select %29, %27, %31 : vector<6x128xi1>, vector<6x128xf32>
    %33 = arith.truncf %32 : vector<6x128xf32> to vector<6x128xbf16>
    %c0_27 = arith.constant 0 : index
    %c0_28 = arith.constant 0 : index
    %c0_29 = arith.constant 0 : index
    %34 = vector.load %arg4[%c0_27, %c0_28, %c0_29] : memref<1x6x128xbf16, #tpu.memory_space<vmem>>, vector<1x6x128xbf16>
    %35 = vector.shape_cast %34 : vector<1x6x128xbf16> to vector<6x128xbf16>
    %36 = vector.shape_cast %33 : vector<6x128xbf16> to vector<1x6x128xbf16>
    tpu.vector_store %arg4[%c0_27, %c0_28, %c0_29], %36 {strides = array<i32>} : memref<1x6x128xbf16, #tpu.memory_space<vmem>>, vector<1x6x128xbf16>,
    return
  }
  func.func @transform_0(%arg0: i32) -> (i32, i32, i32) {
    %c0_i32 = arith.constant 0 : i32
    %c0_i32_0 = arith.constant 0 : i32
    %c0_i32_1 = arith.constant 0 : i32
    return %arg0, %c0_i32, %c0_i32_0 : i32, i32, i32
  }
  func.func @transform_1(%arg0: i32) -> (i32, i32, i32) {
    %c0_i32 = arith.constant 0 : i32
    %c0_i32_0 = arith.constant 0 : i32
    %c0_i32_1 = arith.constant 0 : i32
    %c0_i32_2 = arith.constant 0 : i32
    return %c0_i32, %c0_i32_0, %c0_i32_1 : i32, i32, i32
  }
  func.func @transform_2(%arg0: i32) -> (i32, i32) {
    %c0_i32 = arith.constant 0 : i32
    %c0_i32_0 = arith.constant 0 : i32
    %c0_i32_1 = arith.constant 0 : i32
    return %c0_i32, %c0_i32_0 : i32, i32
  }
  func.func @transform_3(%arg0: i32) -> (i32, i32, i32) {
    %c0_i32 = arith.constant 0 : i32
    %c0_i32_0 = arith.constant 0 : i32
    %c0_i32_1 = arith.constant 0 : i32
    return %arg0, %c0_i32, %c0_i32_0 : i32, i32, i32
  }
}

module attributes {stable_mosaic.version = 11 : i64} {
  func.func @_conv_s2d_kernel(%arg0: i32, %arg1: memref<1x5x512xbf16, #tpu.memory_space<vmem>>, %arg2: memref<4x512x256xbf16, #tpu.memory_space<vmem>>, %arg3: memref<1x256xf32, #tpu.memory_space<vmem>>, %arg4: memref<1x2x256xbf16, #tpu.memory_space<vmem>>) attributes {dimension_semantics = [#tpu.dimension_semantics<parallel>], iteration_bounds = array<i64: 2>, scalar_prefetch = 0 : i64, scratch_operands = 0 : i64, tpu.core_type = #tpu.core_type<tc>, window_params = [{transform_indices = @transform_0, window_bounds = array<i64: 1, 5, 512>}, {pipeline_mode = #tpu.pipeline_mode<synchronous>, transform_indices = @transform_1, window_bounds = array<i64: 4, 512, 256>}, {pipeline_mode = #tpu.pipeline_mode<synchronous>, transform_indices = @transform_2, window_bounds = array<i64: 1, 256>}, {transform_indices = @transform_3, window_bounds = array<i64: 1, 2, 256>}]} {
    %cst = arith.constant 0.000000e+00 : f32
    %0 = vector.broadcast %cst : f32 to vector<2x256xf32>
    %c0 = arith.constant 0 : index
    %c0_0 = arith.constant 0 : index
    %c0_1 = arith.constant 0 : index
    %1 = vector.load %arg1[%c0, %c0_0, %c0_1] : memref<1x5x512xbf16, #tpu.memory_space<vmem>>, vector<1x2x512xbf16>
    %2 = vector.shape_cast %1 : vector<1x2x512xbf16> to vector<2x512xbf16>
    %c0_2 = arith.constant 0 : index
    %c0_3 = arith.constant 0 : index
    %c0_4 = arith.constant 0 : index
    %3 = vector.load %arg2[%c0_2, %c0_3, %c0_4] : memref<4x512x256xbf16, #tpu.memory_space<vmem>>, vector<1x512x256xbf16>
    %4 = vector.shape_cast %3 : vector<1x512x256xbf16> to vector<512x256xbf16>
    %cst_5 = arith.constant dense<0.000000e+00> : vector<2x256xf32>
    %5 = tpu.matmul %2, %4, %cst_5 {dimension_numbers = #tpu.dot_dimension_numbers<[1], [0], [0], [1], [0, 0, 1, 1], [], []>} : vector<2x512xbf16>, vector<512x256xbf16>, vector<2x256xf32> -> vector<2x256xf32>
    %6 = arith.addf %0, %5 : vector<2x256xf32>
    %c0_6 = arith.constant 0 : index
    %c1 = arith.constant 1 : index
    %c0_7 = arith.constant 0 : index
    %7 = vector.load %arg1[%c0_6, %c1, %c0_7] : memref<1x5x512xbf16, #tpu.memory_space<vmem>>, vector<1x2x512xbf16>
    %8 = vector.shape_cast %7 : vector<1x2x512xbf16> to vector<2x512xbf16>
    %c1_8 = arith.constant 1 : index
    %c0_9 = arith.constant 0 : index
    %c0_10 = arith.constant 0 : index
    %9 = vector.load %arg2[%c1_8, %c0_9, %c0_10] : memref<4x512x256xbf16, #tpu.memory_space<vmem>>, vector<1x512x256xbf16>
    %10 = vector.shape_cast %9 : vector<1x512x256xbf16> to vector<512x256xbf16>
    %cst_11 = arith.constant dense<0.000000e+00> : vector<2x256xf32>
    %11 = tpu.matmul %8, %10, %cst_11 {dimension_numbers = #tpu.dot_dimension_numbers<[1], [0], [0], [1], [0, 0, 1, 1], [], []>} : vector<2x512xbf16>, vector<512x256xbf16>, vector<2x256xf32> -> vector<2x256xf32>
    %12 = arith.addf %6, %11 : vector<2x256xf32>
    %c0_12 = arith.constant 0 : index
    %c2 = arith.constant 2 : index
    %c0_13 = arith.constant 0 : index
    %13 = vector.load %arg1[%c0_12, %c2, %c0_13] : memref<1x5x512xbf16, #tpu.memory_space<vmem>>, vector<1x2x512xbf16>
    %14 = vector.shape_cast %13 : vector<1x2x512xbf16> to vector<2x512xbf16>
    %c2_14 = arith.constant 2 : index
    %c0_15 = arith.constant 0 : index
    %c0_16 = arith.constant 0 : index
    %15 = vector.load %arg2[%c2_14, %c0_15, %c0_16] : memref<4x512x256xbf16, #tpu.memory_space<vmem>>, vector<1x512x256xbf16>
    %16 = vector.shape_cast %15 : vector<1x512x256xbf16> to vector<512x256xbf16>
    %cst_17 = arith.constant dense<0.000000e+00> : vector<2x256xf32>
    %17 = tpu.matmul %14, %16, %cst_17 {dimension_numbers = #tpu.dot_dimension_numbers<[1], [0], [0], [1], [0, 0, 1, 1], [], []>} : vector<2x512xbf16>, vector<512x256xbf16>, vector<2x256xf32> -> vector<2x256xf32>
    %18 = arith.addf %12, %17 : vector<2x256xf32>
    %c0_18 = arith.constant 0 : index
    %c3 = arith.constant 3 : index
    %c0_19 = arith.constant 0 : index
    %19 = vector.load %arg1[%c0_18, %c3, %c0_19] : memref<1x5x512xbf16, #tpu.memory_space<vmem>>, vector<1x2x512xbf16>
    %20 = vector.shape_cast %19 : vector<1x2x512xbf16> to vector<2x512xbf16>
    %c3_20 = arith.constant 3 : index
    %c0_21 = arith.constant 0 : index
    %c0_22 = arith.constant 0 : index
    %21 = vector.load %arg2[%c3_20, %c0_21, %c0_22] : memref<4x512x256xbf16, #tpu.memory_space<vmem>>, vector<1x512x256xbf16>
    %22 = vector.shape_cast %21 : vector<1x512x256xbf16> to vector<512x256xbf16>
    %cst_23 = arith.constant dense<0.000000e+00> : vector<2x256xf32>
    %23 = tpu.matmul %20, %22, %cst_23 {dimension_numbers = #tpu.dot_dimension_numbers<[1], [0], [0], [1], [0, 0, 1, 1], [], []>} : vector<2x512xbf16>, vector<512x256xbf16>, vector<2x256xf32> -> vector<2x256xf32>
    %24 = arith.addf %18, %23 : vector<2x256xf32>
    %c0_24 = arith.constant 0 : index
    %c0_25 = arith.constant 0 : index
    %25 = vector.load %arg3[%c0_24, %c0_25] : memref<1x256xf32, #tpu.memory_space<vmem>>, vector<1x256xf32>
    %26 = vector.broadcast %25 : vector<1x256xf32> to vector<2x256xf32>
    %27 = arith.addf %24, %26 : vector<2x256xf32>
    %cst_26 = arith.constant 0.000000e+00 : f32
    %28 = vector.broadcast %cst_26 : f32 to vector<2x256xf32>
    %29 = arith.cmpf ogt, %27, %28 : vector<2x256xf32>
    %cst_27 = arith.constant 2.000000e-01 : f32
    %30 = vector.broadcast %cst_27 : f32 to vector<2x256xf32>
    %31 = arith.mulf %30, %27 : vector<2x256xf32>
    %32 = arith.select %29, %27, %31 : vector<2x256xi1>, vector<2x256xf32>
    %33 = arith.truncf %32 : vector<2x256xf32> to vector<2x256xbf16>
    %c0_28 = arith.constant 0 : index
    %c0_29 = arith.constant 0 : index
    %c0_30 = arith.constant 0 : index
    %34 = vector.load %arg4[%c0_28, %c0_29, %c0_30] : memref<1x2x256xbf16, #tpu.memory_space<vmem>>, vector<1x2x256xbf16>
    %35 = vector.shape_cast %34 : vector<1x2x256xbf16> to vector<2x256xbf16>
    %36 = vector.shape_cast %33 : vector<2x256xbf16> to vector<1x2x256xbf16>
    tpu.vector_store %arg4[%c0_28, %c0_29, %c0_30], %36 {strides = array<i32>} : memref<1x2x256xbf16, #tpu.memory_space<vmem>>, vector<1x2x256xbf16>,
    return
  }
  func.func @transform_0(%arg0: i32) -> (i32, i32, i32) {
    %c0_i32 = arith.constant 0 : i32
    %c0_i32_0 = arith.constant 0 : i32
    %c0_i32_1 = arith.constant 0 : i32
    return %arg0, %c0_i32, %c0_i32_0 : i32, i32, i32
  }
  func.func @transform_1(%arg0: i32) -> (i32, i32, i32) {
    %c0_i32 = arith.constant 0 : i32
    %c0_i32_0 = arith.constant 0 : i32
    %c0_i32_1 = arith.constant 0 : i32
    %c0_i32_2 = arith.constant 0 : i32
    return %c0_i32, %c0_i32_0, %c0_i32_1 : i32, i32, i32
  }
  func.func @transform_2(%arg0: i32) -> (i32, i32) {
    %c0_i32 = arith.constant 0 : i32
    %c0_i32_0 = arith.constant 0 : i32
    %c0_i32_1 = arith.constant 0 : i32
    return %c0_i32, %c0_i32_0 : i32, i32
  }
  func.func @transform_3(%arg0: i32) -> (i32, i32, i32) {
    %c0_i32 = arith.constant 0 : i32
    %c0_i32_0 = arith.constant 0 : i32
    %c0_i32_1 = arith.constant 0 : i32
    return %arg0, %c0_i32, %c0_i32_0 : i32, i32, i32
  }
}

</mosaic_0001>

<bundles_post_ra>
// kernel: encoder_forward.4
= control target key start
LH: loop header
LB: loop body
LE: loop exit
PB: predicated region body
PF: predicated region fallthrough
CT: control target
= control target key end

     0   :  { %8 = vsyncpa [#allocation3], 0  ;;  %s1188_s12 = smov 0   ;;  %s1398_s0 = inlined_call_operand.vmem [shape: bf16[2,82,16], index: 0, kind: input, shape index: {}]   ;;  %s1399_s1 = inlined_call_operand.vmem [shape: bf16[4,16,32], index: 1, kind: input, shape index: {}]   ;;  %s1400_s2 = inlined_call_operand.hbm [shape: f32[1,32], index: 2, kind: input, shape index: {}]   ;;  %s1401_s3 = inlined_call_operand.vmem [shape: bf16[2,72,32], index: 3, kind: output, shape index: {}]  }
   0x1 LB: > { %s1194_s13 = sadd.s32 4294967295, %s1163_s12   ;;  %p906_p0 = scmp.ge.s32.totalorder %s1163_s12, 1  ;;  %s1163_s12 = sphi %s1188_s12, %s14_s12  }
   0x2   : > { %p113_p1 = scmp.lt.s32.totalorder %s1163_s12, 3  ;;  %p1098_p3 = scmp.eq.s32.totalorder %s1194_s13, 0 }
   0x3   : > { %s1165_s15 = smov [#allocation2]  }
   0x4   : > { %p1198_p2 = pnand %p906_p0, %p113_p1  ;;  %s129_s16 = sshll.u32 %s1165_s15, 4  ;;  %s130_s16 = int_to_ptr.vmem [resolvable:$true] %s129_s16 }
   0x5   : > { %s1138_s17 = scalar_lea.vmem %s130_s16, 16  ;;  %s1145_s18 = scalar_lea.vmem %s130_s16, 32 }
   0x6   : > { %p1094_p4 = pneg %p1198_p2  ;;  %p1139_p7 = scmp.ne.s32.totalorder %s130_s16, %s1138_s17 }
   0x7   : > { %p1146_p10 = scmp.lt.s32.totalorder %s130_s16, %s130_s16  ;;  %p1147_p11 = scmp.lt.s32.totalorder %s1145_s18, %s1138_s17 }
   0x8   : > { %p1095_p5 = pnand %p1098_p3, %p1094_p4 }
   0x9   : > { %p1148_p12 = por %p1147_p11, %p1146_p10 }
   0xa   : > { %p1129_p6 = pneg %p1095_p5 }
   0xc   : > { %p1141_p8 = pnand %p1139_p7, %p1129_p6 }
   0xe   : > { %p1142_p9 = pneg %p1141_p8 }
  0x10   : > { %p1149_p13 = pnand %p1148_p12, %p1142_p9 }
  0x12   : > { %1152 = shalt.err (!%p1149_p13)
}
  0x13   : > { %1097 = dma.hbm_to_vmem [thread:$0]  (!%p1095_p5), %s1400_s2, 16, %s130_s16, [#allocation3]  }
  0x14   : > { %150 = sbr.rel (%p1198_p2) target bundleno = 317 (0x13d), region = 32 }
  0x19   : > { %1158 = dma.done.wait (%p1098_p3), [#allocation3], 16  }
  0x1a   : > { %1160 = vsyncadd (%p1098_p3), [#allocation3], 4294967280  ;;  %p174_p0 = scmp.lt.s32.totalorder %s1194_s13, 1  ;;  %v1166_v0 = vmov 0.0   ;;  %vm1167_vm0 = vmmov 0   ;;  %v1111_v1 = vld [vmem:[%s1399_s1] sm:$0xff]  }
  0x1b   : > { %1022 = vmatprep.subr.bf16.mxu1 %v1166_v0  ;;  %1000 = vmatprep.subr.bf16.mxu0 %v1166_v0  ;;  %v1112_v2 = vld [vmem:[%s1399_s1 + $0x8] sm:$0xff]   ;;  %vm271_vm1 = vcmask 130048   ;;  %v1116_v9 = vld [vmem:[%s1399_s1 + $0x18] sm:$0xff]   ;;  %vm225_vm2 = vsmask.f32 7424  ;;  %v1115_v13 = vld [vmem:[%s1399_s1 + $0x10] sm:$0xff]  }
  0x1c   : > { %1024 = vmatprep.mubr.msk.bf16.mxu1 %vm1167_vm0, %v1166_v0  ;;  %s1404_s13 = smov (!%p174_p0, %s1194_s13), 1  ;;  %1002 = vmatprep.mubr.msk.bf16.mxu0 %vm1167_vm0, %v1166_v0  ;;  %vm635_vm3 = vcmask 1046528   ;;  %vm827_vm5 = vcmask 257024  }
  0x1d   : > { %s1088_s21 = smul.u32 44, %s1404_s13  ;;  %1023 = vmatpush3.bf16.msra.mxu1 %v1111_v1  ;;  %1001 = vmatpush3.bf16.msra.mxu0 %v1112_v2 }
  0x1e   : > { %1066 = vmatprep.subr.bf16.mxu1 %v1166_v0  ;;  %1044 = vmatprep.subr.bf16.mxu0 %v1166_v0  ;;  %s1089_s6 = smul.u32 36, %s1404_s13 }
  0x1f   : > { %s1230_s24 = scalar_lea.vmem %s1398_s0, %s1088_s21 }
  0x20   : > { %v1113_v3 = vld [vmem:[%s1230_s24] sm:$0xff]   ;;  %v1114_v4 = vld [vmem:[%s1230_s24 + $0x8] sm:$0xff]   ;;  %v1117_v11 = vld [vmem:[%s1230_s24 + $0x10] sm:$0xff]   ;;  %s1356_s9 = scalar_lea.vmem %s1401_s3, %s1089_s6 }
  0x21   : > { %v227_v5 = vshrl.u32 %v1113_v3, 16  ;;  %v229_v6 = vshll.u32 %v1113_v3, 16  ;;  %1025 = vmatmul.mubr.msk.bf16.vlgmr.msra.gmra.mxu1 %vm271_vm1, %v1113_v3  ;;  %v234_v7 = vshll.u32 %v1114_v4, 16  ;;  %v238_v14 = vshrl.u32 %v1114_v4, 16  ;;  %v1118_v19 = vld [vmem:[%s1230_s24 + $0x18] sm:$0xff]   ;;  %v1122_v39 = vld [vmem:[%s1230_s24 + $0xc] sm:$0xff]  }
  0x22   : > { %1028 = vmatprep.mubr.msk.bf16.mxu1 %vm1167_vm0, %v1166_v0  ;;  %1067 = vmatpush3.bf16.msra.mxu1 %v1116_v9  ;;  %v242_v15 = vshll.u32 %v1117_v11, 16  ;;  %v246_v21 = vshrl.u32 %v1117_v11, 16  ;;  %v250_v22 = vshll.u32 %v1118_v19, 16  ;;  %v193_v23 = vld [vmem:[%s1230_s24 + $0x20] sm:$0xf]  ;;  %v254_v29 = vshrl.u32 %v1118_v19, 16 }
  0x23   : > { %v231_v8 = vrot.slane %v229_v6, 1  ;;  %v236_v10 = vrot.slane %v234_v7, 1  ;;  %v196_v24 = vld [vmem:[%s1230_s24 + $0x24] sm:$0x1]  ;;  %v450_v34 = vld [vmem:[%s1230_s24 + $0x8] sm:$0xf]  ;;  %v926_v38 = vcombine.low %v193_v23, %v193_v23 }
  0x24   : > { %v244_v18 = vrot.slane %v242_v15, 1  ;;  %v252_v26 = vrot.slane %v250_v22, 1  ;;  %v919_v27 = vcombine.low %v193_v23, %v196_v24  ;;  %v449_v33 = vld [vmem:[%s1230_s24 + $0x4] sm:$0xf]  ;;  %v637_v44 = vrot.slane %v1122_v39, 1  ;;  %v1124_v50 = vld [vmem:[%s1230_s24 + $0x14] sm:$0xff]  }
  0x25   : > { %v232_v12 = vor.u32 %v231_v8, %v227_v5  ;;  %v240_v17 = vor.u32 %v238_v14, %v236_v10  ;;  %v628_v35 = vld [vmem:[%s1230_s24 + $0x4] sm:$0xe]  ;;  %v935_v37 = vcombine.low %v449_v33, %v450_v34  ;;  %v495_v48 = vshll.u32 %v1122_v39, 16  ;;  %v1125_v58 = vld [vmem:[%s1230_s24 + $0x1c] sm:$0xff]  }
  0x26   : > { %v248_v25 = vor.u32 %v246_v21, %v244_v18  ;;  %v258_v30 = vshll.u32 %v919_v27, 16  ;;  %v256_v31 = vor.u32 %v254_v29, %v252_v26  ;;  %v948_v40 = vcombine.low %v628_v35, %v450_v34  ;;  %v1126_v3 = vld [vmem:[%s1230_s24 + $0x24] sm:$0x1f]  }
  0x27   : > { %v237_v16 = vsel %vm225_vm2, %v232_v12, %v236_v10  ;;  %v245_v20 = vsel %vm225_vm2, %v240_v17, %v244_v18  ;;  %v262_v41 = vshrl.u32 %v919_v27, 16  ;;  %v490_v42 = vshll.u32 %v935_v37, 16 }
  0x28   : > { %1003 = vmatmul.mubr.msk.bf16.vlgmr.msra.gmra.mxu0 %vm271_vm1, %v237_v16  ;;  %v253_v28 = vsel %vm225_vm2, %v248_v25, %v252_v26  ;;  %v260_v32 = vrot.slane %v258_v30, 1  ;;  %v636_v43 = vrot.slane %v948_v40, 1  ;;  %v488_v46 = vshrl.u32 %v935_v37, 16 }
  0x29   : > { %1045 = vmatpush3.bf16.msra.mxu0 %v1115_v13  ;;  %1006 = vmatprep.mubr.msk.bf16.mxu0 %vm1167_vm0, %v1166_v0  ;;  %v492_v47 = vrot.slane %v490_v42, 1  ;;  %v497_v52 = vrot.slane %v495_v48, 1  ;;  %v639_v53 = vrot.slane %v1124_v50, 1  ;;  %v499_v55 = vshrl.u32 %v1122_v39, 16 }
  0x2a   : > { %1029 = vmatmul.mubr.msk.bf16.gmra.mxu1 %vm271_vm1, %v1114_v4  ;;  %v261_v36 = vsel %vm225_vm2, %v256_v31, %v260_v32  ;;  %v264_v45 = vor.u32 %v262_v41, %v260_v32  ;;  %v638_v49 = vsel %vm635_vm3, %v636_v43, %v637_v44  ;;  %v503_v56 = vshll.u32 %v1124_v50, 16 }
  0x2b   : > { %1032 = vmatprep.mubr.msk.bf16.mxu1 %vm1167_vm0, %v1166_v0  ;;  %v493_v51 = vor.u32 %v492_v47, %v488_v46  ;;  %v640_v57 = vsel %vm635_vm3, %v637_v44, %v639_v53  ;;  %v501_v59 = vor.u32 %v499_v55, %v497_v52  ;;  %v641_v61 = vrot.slane %v1125_v58, 1 }
  0x2c   : > { %v505_v60 = vrot.slane %v503_v56, 1  ;;  %v507_v63 = vshrl.u32 %v1124_v50, 16  ;;  %v511_v1 = vshll.u32 %v1125_v58, 16  ;;  %v643_v6 = vrot.slane %v1126_v3, 1 }
  0x2d   : > { %v498_v54 = vsel %vm225_vm2, %v493_v51, %v497_v52  ;;  %v642_v2 = vsel %vm635_vm3, %v639_v53, %v641_v61  ;;  %v515_v8 = vshrl.u32 %v1125_v58, 16  ;;  %v519_v9 = vshll.u32 %v1126_v3, 16 }
  0x2e   : > { %v506_v62 = vsel %vm225_vm2, %v501_v59, %v505_v60  ;;  %v509_v4 = vor.u32 %v507_v63, %v505_v60  ;;  %v513_v5 = vrot.slane %v511_v1, 1  ;;  %v644_v10 = vsel %vm635_vm3, %v641_v61, %v643_v6 }
  0x2f   : > { %v521_v12 = vrot.slane %v519_v9, 1  ;;  %v523_v14 = vshrl.u32 %v1126_v3, 16 }
  0x30   : > { %1007 = vmatmul.mubr.msk.bf16.gmra.mxu0 %vm271_vm1, %v245_v20  ;;  %v514_v7 = vsel %vm225_vm2, %v509_v4, %v513_v5 }
  0x31   : > { %1010 = vmatprep.mubr.msk.bf16.mxu0 %vm1167_vm0, %v1166_v0  ;;  %v525_v15 = vor.u32 %v523_v14, %v521_v12 }
  0x32   : > { %1033 = vmatmul.mubr.msk.bf16.gmra.mxu1 %vm271_vm1, %v1117_v11  ;;  %v517_v11 = vor.u32 %v515_v8, %v513_v5 }
  0x33   : > { %1036 = vmatprep.mubr.msk.bf16.mxu1 %vm1167_vm0, %v1166_v0 }
  0x34   : > { %v522_v13 = vsel %vm225_vm2, %v517_v11, %v521_v12 }
  0x38   : > { %1011 = vmatmul.mubr.msk.bf16.gmra.mxu0 %vm271_vm1, %v253_v28 }
  0x39   : > { %1014 = vmatprep.mubr.msk.bf16.mxu0 %vm1167_vm0, %v1166_v0 }
  0x3a   : > { %1037 = vmatmul.mubr.msk.bf16.gmra.mxu1 %vm271_vm1, %v1118_v19 }
  0x3b   : > { %1040 = vmatprep.mubr.msk.bf16.mxu1 %vm1167_vm0, %v1166_v0 }
  0x40   : > { %1015 = vmatmul.mubr.msk.bf16.gmra.mxu0 %vm271_vm1, %v261_v36 }
  0x41   : > { %1018 = vmatprep.mubr.msk.bf16.mxu0 %vm1167_vm0, %v1166_v0 }
  0x42   : > { %1041 = vmatmul.mubr.msk.bf16.gmra.mxu1 %vm271_vm1, %v926_v38 }
  0x43   : > { %1068 = vmatprep.mubr.msk.bf16.mxu1 %vm1167_vm0, %v1166_v0 }
  0x48   : > { %1019 = vmatmul.mubr.msk.bf16.gmra.mxu0 %vm271_vm1, %v264_v45 }
  0x49   : > { %1046 = vmatprep.mubr.msk.bf16.mxu0 %vm1167_vm0, %v1166_v0 }
  0x4a   : > { %1069 = vmatmul.mubr.msk.bf16.vlgmr.msra.gmra.mxu1 %vm271_vm1, %v638_v49 }
  0x4b   : > { %1072 = vmatprep.mubr.msk.bf16.mxu1 %vm1167_vm0, %v1166_v0 }
  0x50   : > { %1047 = vmatmul.mubr.msk.bf16.vlgmr.msra.gmra.mxu0 %vm271_vm1, %v498_v54 }
  0x51   : > { %1050 = vmatprep.mubr.msk.bf16.mxu0 %vm1167_vm0, %v1166_v0 }
  0x52   : > { %1073 = vmatmul.mubr.msk.bf16.gmra.mxu1 %vm271_vm1, %v640_v57 }
  0x53   : > { %1076 = vmatprep.mubr.msk.bf16.mxu1 %vm1167_vm0, %v1166_v0 }
  0x58   : > { %1051 = vmatmul.mubr.msk.bf16.gmra.mxu0 %vm271_vm1, %v506_v62  ;;  %v1349_v62 = vld [vmem:[#allocation2] ss:$0 sm:$0xff] }
  0x59   : > { %1054 = vmatprep.mubr.msk.bf16.mxu0 %vm1167_vm0, %v1166_v0 }
  0x5a   : > { %1077 = vmatmul.mubr.msk.bf16.gmra.mxu1 %vm271_vm1, %v642_v2 }
  0x5b   : > { %1080 = vmatprep.mubr.msk.bf16.mxu1 %vm1167_vm0, %v1166_v0 }
  0x60   : > { %1055 = vmatmul.mubr.msk.bf16.gmra.mxu0 %vm271_vm1, %v514_v7 }
  0x61   : > { %1058 = vmatprep.mubr.msk.bf16.mxu0 %vm1167_vm0, %v1166_v0 }
  0x62   : > { %1081 = vmatmul.mubr.msk.bf16.gmra.mxu1 %vm271_vm1, %v644_v10 }
  0x63   : > { %1084 = vmatprep.mubr.msk.bf16.mxu1 %vm1167_vm0, %v1166_v0 }
  0x68   : > { %1059 = vmatmul.mubr.msk.bf16.gmra.mxu0 %vm271_vm1, %v522_v13 }
  0x69   : > { %1062 = vmatprep.mubr.msk.bf16.mxu0 %vm1167_vm0, %v1166_v0 }
  0x6a   : > { %1085 = vmatmul.mubr.msk.bf16.gmra.mxu1 %vm271_vm1, %v643_v6 }
  0x70   : > { %1063 = vmatmul.mubr.msk.bf16.gmra.mxu0 %vm271_vm1, %v525_v15 }
  0xe1   : > { %v411_v16 = vpop.f32.mrf.mxu1 }
  0xe3   : > { %v1026_v17 = vpop.f32.mrf.mxu1 }
  0xe5   : > { %v414_v18 = vpop.f32.mrf.mxu1 }
  0xe7   : > { %v1027_v20 = vpop.f32.mrf.mxu1 }
  0xe8   : > { %v321_v19 = vpop.f32.mrf.mxu0 }
  0xe9   : > { %v412_v58 = vadd.f32 %v411_v16, %v321_v19 }
  0xea   : > { %v1004_v21 = vpop.f32.mrf.mxu0  ;;  %v419_v22 = vpop.f32.mrf.mxu1 }
  0xec   : > { %v324_v23 = vpop.f32.mrf.mxu0  ;;  %v1030_v24 = vpop.f32.mrf.mxu1 }
  0xed   : > { %v415_v2 = vadd.f32 %v414_v18, %v324_v23 }
  0xee   : > { %v1005_v25 = vpop.f32.mrf.mxu0  ;;  %v1327_v26 = vpop.f32.mrf.mxu1 }
  0xf0   : > { %v329_v27 = vpop.f32.mrf.mxu0  ;;  %v1031_v28 = vpop.f32.mrf.mxu1 }
  0xf1   : > { %v420_v10 = vadd.f32 %v419_v22, %v329_v27 }
  0xf2   : > { %v1008_v0 = vpop.f32.mrf.mxu0  ;;  %v1329_v29 = vpop.f32.mrf.mxu1 }
  0xf4   : > { %v332_v30 = vpop.f32.mrf.mxu0  ;;  %v1034_v31 = vpop.f32.mrf.mxu1 }
  0xf5   : > { %v423_v21 = vadd.f32 %v1327_v26, %v332_v30 }
  0xf6   : > { %v1009_v32 = vpop.f32.mrf.mxu0  ;;  %v1331_v33 = vpop.f32.mrf.mxu1 }
  0xf8   : > { %v1333_v34 = vpop.f32.mrf.mxu0  ;;  %v1035_v35 = vpop.f32.mrf.mxu1 }
  0xfa   : > { %v1012_v36 = vpop.f32.mrf.mxu0  ;;  %v1335_v37 = vpop.f32.mrf.mxu1 }
  0xfb   : > { %v428_v36 = vadd.f32 %v1329_v29, %v1333_v34 }
  0xfc   : > { %v1337_v38 = vpop.f32.mrf.mxu0  ;;  %v1038_v39 = vpop.f32.mrf.mxu1 }
  0xfe   : > { %v1013_v40 = vpop.f32.mrf.mxu0  ;;  %v1339_v41 = vpop.f32.mrf.mxu1 }
 0x100   : > { %v1341_v42 = vpop.f32.mrf.mxu0  ;;  %v1039_v43 = vpop.f32.mrf.mxu1 }
 0x102   : > { %v1016_v44 = vpop.f32.mrf.mxu0  ;;  %v1343_v45 = vpop.f32.mrf.mxu1 }
 0x104   : > { %v1345_v46 = vpop.f32.mrf.mxu0  ;;  %v1042_v47 = vpop.f32.mrf.mxu1 }
 0x106   : > { %v1017_v48 = vpop.f32.mrf.mxu0  ;;  %v446_v49 = vpop.f32.mrf.mxu1 }
 0x108   : > { %v1347_v50 = vpop.f32.mrf.mxu0  ;;  %v1043_v51 = vpop.f32.mrf.mxu1 }
 0x10a   : > { %v1020_v52 = vpop.f32.mrf.mxu0  ;;  %v700_v53 = vpop.f32.mrf.mxu1 }
 0x10b   : > { %v431_v52 = vadd.f32 %v1331_v33, %v1337_v38 }
 0x10c   : > { %v356_v54 = vpop.f32.mrf.mxu0  ;;  %v1070_v55 = vpop.f32.mrf.mxu1 }
 0x10e   : > { %v1021_v56 = vpop.f32.mrf.mxu0  ;;  %v703_v57 = vpop.f32.mrf.mxu1 }
 0x110   : > { %v581_v59 = vpop.f32.mrf.mxu0  ;;  %v1071_v60 = vpop.f32.mrf.mxu1 }
 0x111   : > { %v619_v61 = vadd.f32 %v581_v59, %v412_v58 }
 0x112   : > { %v1048_v63 = vpop.f32.mrf.mxu0  ;;  %v708_v1 = vpop.f32.mrf.mxu1 }
 0x113   : > { %v738_v3 = vadd.f32 %v700_v53, %v619_v61  ;;  %v436_v61 = vadd.f32 %v1335_v37, %v1341_v42 }
 0x114   : > { %v584_v4 = vpop.f32.mrf.mxu0  ;;  %v1074_v5 = vpop.f32.mrf.mxu1 }
 0x115   : > { %v754_v6 = vadd.f32 %v1349_v62, %v738_v3  ;;  %v620_v7 = vadd.f32 %v584_v4, %v415_v2 }
 0x116   : > { %v1049_v8 = vpop.f32.mrf.mxu0  ;;  %v711_v9 = vpop.f32.mrf.mxu1 }
 0x117   : > { %vm763_vm4 = vcmp.gt.f32.partialorder %v754_v6, 0.0  ;;  %v772_v11 = vmul.f32 0.2, %v754_v6  ;;  %v739_v12 = vadd.f32 %v703_v57, %v620_v7  ;;  %v439_v8 = vadd.f32 %v1339_v41, %v1345_v46 }
 0x118   : > { %v589_v13 = vpop.f32.mrf.mxu0  ;;  %v1075_v14 = vpop.f32.mrf.mxu1 }
 0x119   : > { %v781_v15 = vsel %vm763_vm4, %v754_v6, %v772_v11  ;;  %v755_v16 = vadd.f32 %v1349_v62, %v739_v12  ;;  %v621_v17 = vadd.f32 %v589_v13, %v420_v10 }
 0x11a   : > { %v967_v18 = vpack.c.bf16 %v781_v15, %v781_v15  ;;  %v1052_v19 = vpop.f32.mrf.mxu0  ;;  %v716_v20 = vpop.f32.mrf.mxu1 }
 0x11b   : > { %vm764_vm6 = vcmp.gt.f32.partialorder %v755_v16, 0.0  ;;  %v773_v22 = vmul.f32 0.2, %v755_v16  ;;  %v740_v23 = vadd.f32 %v708_v1, %v621_v17  ;;  %v444_v17 = vadd.f32 %v1343_v45, %v1347_v50 }
 0x11c   : > { %828 = vst.msk [vmem:[%s1356_s9] sm:$0xf] %vm827_vm5, %v967_v18  ;;  %v592_v24 = vpop.f32.mrf.mxu0  ;;  %v1078_v25 = vpop.f32.mrf.mxu1 }
 0x11d   : > { %v782_v27 = vsel %vm764_vm6, %v755_v16, %v773_v22  ;;  %v756_v28 = vadd.f32 %v1349_v62, %v740_v23  ;;  %v622_v0 = vadd.f32 %v592_v24, %v423_v21 }
 0x11e   : > { %v968_v31 = vpack.c.bf16 %v782_v27, %v782_v27  ;;  %v1053_v32 = vpop.f32.mrf.mxu0  ;;  %v719_v35 = vpop.f32.mrf.mxu1 }
 0x11f   : > { %vm765_vm7 = vcmp.gt.f32.partialorder %v756_v28, 0.0  ;;  %v774_v26 = vmul.f32 0.2, %v756_v28  ;;  %v741_v30 = vadd.f32 %v711_v9, %v622_v0 }
 0x120   : > { %829 = vst.msk [vmem:[%s1356_s9 + $0x4] sm:$0xf] %vm827_vm5, %v968_v31  ;;  %v597_v39 = vpop.f32.mrf.mxu0  ;;  %v1079_v40 = vpop.f32.mrf.mxu1 }
 0x121   : > { %v783_v43 = vsel %vm765_vm7, %v756_v28, %v774_v26  ;;  %v757_v44 = vadd.f32 %v1349_v62, %v741_v30  ;;  %v623_v47 = vadd.f32 %v597_v39, %v428_v36 }
 0x122   : > { %v969_v48 = vpack.c.bf16 %v783_v43, %v783_v43  ;;  %v1056_v49 = vpop.f32.mrf.mxu0  ;;  %v724_v51 = vpop.f32.mrf.mxu1 }
 0x123   : > { %vm766_vm8 = vcmp.gt.f32.partialorder %v757_v44, 0.0  ;;  %v775_v29 = vmul.f32 0.2, %v757_v44  ;;  %v742_v34 = vadd.f32 %v716_v20, %v623_v47 }
 0x124   : > { %830 = vst.msk [vmem:[%s1356_s9 + $0x8] sm:$0xf] %vm827_vm5, %v969_v48  ;;  %v600_v53 = vpop.f32.mrf.mxu0  ;;  %v1082_v54 = vpop.f32.mrf.mxu1 }
 0x125   : > { %v784_v55 = vsel %vm766_vm8, %v757_v44, %v775_v29  ;;  %v758_v56 = vadd.f32 %v1349_v62, %v742_v34  ;;  %v624_v57 = vadd.f32 %v600_v53, %v431_v52 }
 0x126   : > { %v970_v58 = vpack.c.bf16 %v784_v55, %v784_v55  ;;  %v1057_v59 = vpop.f32.mrf.mxu0  ;;  %v727_v60 = vpop.f32.mrf.mxu1 }
 0x127   : > { %vm767_vm9 = vcmp.gt.f32.partialorder %v758_v56, 0.0  ;;  %v776_v33 = vmul.f32 0.2, %v758_v56  ;;  %v743_v38 = vadd.f32 %v719_v35, %v624_v57 }
 0x128   : > { %831 = vst.msk [vmem:[%s1356_s9 + $0xc] sm:$0xf] %vm827_vm5, %v970_v58  ;;  %v605_v63 = vpop.f32.mrf.mxu0  ;;  %v1083_v1 = vpop.f32.mrf.mxu1 }
 0x129   : > { %v785_v2 = vsel %vm767_vm9, %v758_v56, %v776_v33  ;;  %v759_v3 = vadd.f32 %v1349_v62, %v743_v38  ;;  %v625_v4 = vadd.f32 %v605_v63, %v436_v61 }
 0x12a   : > { %v971_v5 = vpack.c.bf16 %v785_v2, %v785_v2  ;;  %v1060_v6 = vpop.f32.mrf.mxu0  ;;  %v732_v7 = vpop.f32.mrf.mxu1 }
 0x12b   : > { %vm768_vm10 = vcmp.gt.f32.partialorder %v759_v3, 0.0  ;;  %v777_v37 = vmul.f32 0.2, %v759_v3  ;;  %v744_v42 = vadd.f32 %v724_v51, %v625_v4 }
 0x12c   : > { %832 = vst.msk [vmem:[%s1356_s9 + $0x10] sm:$0xf] %vm827_vm5, %v971_v5  ;;  %v608_v9 = vpop.f32.mrf.mxu0  ;;  %v1086_v10 = vpop.f32.mrf.mxu1 }
 0x12d   : > { %v786_v11 = vsel %vm768_vm10, %v759_v3, %v777_v37  ;;  %v760_v12 = vadd.f32 %v1349_v62, %v744_v42  ;;  %v626_v13 = vadd.f32 %v608_v9, %v439_v8 }
 0x12e   : > { %v972_v14 = vpack.c.bf16 %v786_v11, %v786_v11  ;;  %v1061_v15 = vpop.f32.mrf.mxu0  ;;  %v735_v16 = vpop.f32.mrf.mxu1 }
 0x12f   : > { %vm769_vm11 = vcmp.gt.f32.partialorder %v760_v12, 0.0  ;;  %v778_v41 = vmul.f32 0.2, %v760_v12  ;;  %v745_v46 = vadd.f32 %v727_v60, %v626_v13 }
 0x130   : > { %833 = vst.msk [vmem:[%s1356_s9 + $0x14] sm:$0xf] %vm827_vm5, %v972_v14  ;;  %v613_v18 = vpop.f32.mrf.mxu0  ;;  %v1087_v19 = vpop.f32.mrf.mxu1 }
 0x131   : > { %v787_v20 = vsel %vm769_vm11, %v760_v12, %v778_v41  ;;  %v761_v21 = vadd.f32 %v1349_v62, %v745_v46  ;;  %v627_v22 = vadd.f32 %v613_v18, %v444_v17 }
 0x132   : > { %v973_v23 = vpack.c.bf16 %v787_v20, %v787_v20  ;;  %v1064_v24 = vpop.f32.mrf.mxu0 }
 0x133   : > { %vm770_vm12 = vcmp.gt.f32.partialorder %v761_v21, 0.0  ;;  %v779_v25 = vmul.f32 0.2, %v761_v21  ;;  %v746_v27 = vadd.f32 %v732_v7, %v627_v22 }
 0x134   : > { %834 = vst.msk [vmem:[%s1356_s9 + $0x18] sm:$0xf] %vm827_vm5, %v973_v23  ;;  %v616_v45 = vpop.f32.mrf.mxu0 }
 0x135   : > { %v788_v50 = vsel %vm770_vm12, %v761_v21, %v779_v25  ;;  %v762_v28 = vadd.f32 %v1349_v62, %v746_v27 }
 0x136   : > { %v974_v0 = vpack.c.bf16 %v788_v50, %v788_v50  ;;  %v1065_v31 = vpop.f32.mrf.mxu0 }
 0x137   : > { %vm771_vm13 = vcmp.gt.f32.partialorder %v762_v28, 0.0  ;;  %v780_v32 = vmul.f32 0.2, %v762_v28 }
 0x138   : > { %835 = vst.msk [vmem:[%s1356_s9 + $0x1c] sm:$0xf] %vm827_vm5, %v974_v0 }
 0x139   : > { %v789_v35 = vsel %vm771_vm13, %v762_v28, %v780_v32 }
 0x13a   : > { %v975_v36 = vpack.c.bf16 %v789_v35, %v789_v35 }
 0x13c   : > { %836 = vst.msk [vmem:[%s1356_s9 + $0x20] sm:$0xf] %vm827_vm5, %v975_v36 }
 0x13d PF: > { %s14_s12 = sadd.s32 1, %s1163_s12  }
 0x13e   : > { %p11_p1 = scmp.ge.s32.totalorder %s14_s12, 4  }
 0x140   :  { %13 = sbr.rel (!%p11_p1) target bundleno = 1 (0x1), region = 70 }
 0x145   :  { %858 = vsyncpa [#allocation3], 1 }
 0x146   :  { %860 = vsyncpa [#allocation3 + $0x1], 1 }

// kernel: encoder_forward.5
= control target key start
LH: loop header
LB: loop body
LE: loop exit
PB: predicated region body
PF: predicated region fallthrough
CT: control target
= control target key end

     0   :  { %s1099_s12 = smov 0   ;;  %s1229_s0 = inlined_call_operand.vmem [shape: bf16[2,26,128], index: 0, kind: input, shape index: {}]   ;;  %s1230_s1 = inlined_call_operand.vmem [shape: bf16[4,128,64], index: 1, kind: input, shape index: {}]   ;;  %s1231_s2 = inlined_call_operand.vmem [shape: f32[1,64], index: 2, kind: input, shape index: {}]   ;;  %s1232_s3 = inlined_call_operand.vmem [shape: bf16[2,20,64], index: 3, kind: output, shape index: {}]  }
   0x1 LB: > { %s800_s13 = sadd.s32 4294967295, %s1077_s12   ;;  %p804_p0 = scmp.ge.s32.totalorder %s1077_s12, 1  ;;  %s1077_s12 = sphi %s1099_s12, %s13_s12  }
   0x2   : > { %p137_p1 = scmp.lt.s32.totalorder %s1077_s12, 3 }
   0x4   : > { %p138_p2 = pnand %p804_p0, %p137_p1 }
   0x5   : > { %p161_p3 = scmp.lt.s32.totalorder (!%p138_p2), %s800_s13, 1 }
   0x6   : > { %141 = sbr.rel (%p138_p2) target bundleno = 287 (0x11f), region = 32 }
   0xb   : > { %v1033_v0 = vld [vmem:[%s1230_s1 + $0x78] sm:$0xff]   ;;  %v1035_v2 = vld [vmem:[%s1230_s1 + $0x70] sm:$0xff]   ;;  %v1037_v4 = vld [vmem:[%s1230_s1 + $0x68] sm:$0xff]   ;;  %s1234_s13 = smov (!%p161_p3, %s800_s13), 1  ;;  %vm217_vm0 = vsmask.f32 7424 }
   0xc   : > { %v1034_v1 = vld [vmem:[%s1230_s1 + $0x38] sm:$0xff]   ;;  %944 = vmatprep.subr.bf16.mxu0 %v1033_v0  ;;  %v1036_v3 = vld [vmem:[%s1230_s1 + $0x30] sm:$0xff]   ;;  %v1038_v5 = vld [vmem:[%s1230_s1 + $0x28] sm:$0xff]   ;;  %s900_s30 = sshll.u32 %s1234_s13, 4  ;;  %vm603_vm1 = vcmask 1044480   ;;  %s1024_s7 = smul.u32 12, %s1234_s13 }
   0xd   : > { %964 = vmatprep.subr.bf16.mxu1 %v1034_v1  ;;  %945 = vmatpush3.bf16.msra.mxu0 %v1033_v0  ;;  %v1039_v6 = vld [vmem:[%s1230_s1 + $0x60] sm:$0xff]   ;;  %v1041_v8 = vld [vmem:[%s1230_s1 + $0x58] sm:$0xff]   ;;  %s1143_s10 = scalar_lea.vmem %s1229_s0, %s900_s30  ;;  %v1043_v10 = vld [vmem:[%s1230_s1 + $0x50] sm:$0xff]   ;;  %vm463_vm2 = vsmask.f32 5376  ;;  %vm743_vm4 = vcmask 517120  }
   0xe   : > { %965 = vmatpush3.bf16.msra.mxu1 %v1034_v1  ;;  %946 = vmatprep.subr.bf16.mxu0 %v1035_v2  ;;  %v1040_v7 = vld [vmem:[%s1230_s1 + $0x20] sm:$0xff]   ;;  %v1042_v9 = vld [vmem:[%s1230_s1 + $0x18] sm:$0xff]   ;;  %v1044_v11 = vld [vmem:[%s1230_s1 + $0x10] sm:$0xff]   ;;  %s170_s11 = scalar_lea.vmem %s1232_s3, %s1024_s7  ;;  %vm740_vm6 = vcmask 519168  }
   0xf   : > { %966 = vmatprep.subr.bf16.mxu1 %v1036_v3  ;;  %v1049_v12 = vld [vmem:[%s1143_s10] sm:$0xff]   ;;  %v1050_v13 = vld [vmem:[%s1143_s10 + $0x8] ss:$0 sps:$4 sm:$0x77]   ;;  %v1052_v26 = vld [vmem:[%s1230_s1 + $0xb8] sm:$0xff]  }
  0x10   : > { %v1045_v14 = vld [vmem:[%s1230_s1 + $0x48] sm:$0xff]   ;;  %v219_v16 = vshrl.u32 %v1049_v12, 16  ;;  %v221_v17 = vshll.u32 %v1049_v12, 16  ;;  %v226_v18 = vshll.u32 %v1050_v13, 16  ;;  %980 = vmatprep.mubr.bf16.mxu1 %v1049_v12  ;;  %v1047_v22 = vld [vmem:[%s1230_s1 + $0x40] sm:$0xff]   ;;  %v230_v25 = vshrl.u32 %v1050_v13, 16 }
  0x11   : > { %947 = vmatpush3.bf16.msra.mxu0 %v1035_v2  ;;  %v1046_v15 = vld [vmem:[%s1230_s1 + $0x8] sm:$0xff]   ;;  %v1048_v23 = vld [vmem:[%s1230_s1] sm:$0xff]   ;;  %v1053_v28 = vld [vmem:[%s1230_s1 + $0xf8] sm:$0xff]  }
  0x12   : > { %967 = vmatpush3.bf16.msra.mxu1 %v1036_v3  ;;  %948 = vmatprep.subr.bf16.mxu0 %v1037_v4  ;;  %v223_v19 = vrot.slane %v221_v17, 1  ;;  %v228_v20 = vrot.slane %v226_v18, 1  ;;  %v1051_v27 = vld [vmem:[%s1143_s10 + $0x8] ss:$0 sps:$4 sm:$0x33]   ;;  %v1054_v30 = vld [vmem:[%s1230_s1 + $0xb0] sm:$0xff]  }
  0x13   : > { %968 = vmatprep.subr.bf16.mxu1 %v1038_v5  ;;  %v1055_v31 = vld [vmem:[%s1230_s1 + $0xf0] sm:$0xff]   ;;  %v1056_v32 = vld [vmem:[%s1230_s1 + $0xa8] sm:$0xff]   ;;  %v432_v33 = vld [vmem:[%s1143_s10] sm:$0xc] }
  0x14   : > { %v224_v21 = vor.u32 %v223_v19, %v219_v16  ;;  %v232_v29 = vor.u32 %v230_v25, %v228_v20  ;;  %v433_v34 = vld [vmem:[%s1143_s10 + $0x4] sm:$0xf]  ;;  %v1069_v36 = vld [vmem:[%s1143_s10 + $0x8] sm:$0x1f]   ;;  %v582_v38 = vld [vmem:[%s1143_s10] sm:$0x8] }
  0x15   : > { %949 = vmatpush3.bf16.msra.mxu0 %v1037_v4  ;;  %v859_v35 = vcombine.low %v432_v33, %v433_v34  ;;  %v1057_v37 = vld [vmem:[%s1230_s1 + $0xe8] sm:$0xff]   ;;  %v473_v41 = vshrl.u32 %v1069_v36, 16  ;;  %v476_v42 = vshll.u32 %v1069_v36, 16  ;;  %v885_v43 = vcombine.low %v582_v38, %v433_v34  ;;  %v1058_v45 = vld [vmem:[%s1230_s1 + $0xa0] sm:$0xff]   ;;  %v1060_v55 = vld [vmem:[%s1230_s1 + $0x98] sm:$0xff]  }
  0x16   : > { %969 = vmatpush3.bf16.msra.mxu1 %v1038_v5  ;;  %950 = vmatprep.subr.bf16.mxu0 %v1039_v6  ;;  %v229_v24 = vsel %vm217_vm0, %v224_v21, %v228_v20  ;;  %v605_v44 = vrot.slane %v1069_v36, 3  ;;  %v1059_v50 = vld [vmem:[%s1230_s1 + $0xe0] sm:$0xff]   ;;  %v1061_v57 = vld [vmem:[%s1230_s1 + $0xd8] sm:$0xff]   ;;  %v1062_v58 = vld [vmem:[%s1230_s1 + $0x90] sm:$0xff]  }
  0x17   : > { %970 = vmatprep.subr.bf16.mxu1 %v1040_v7  ;;  %960 = vmatprep.mubr.bf16.mxu0 %v229_v24  ;;  %v465_v39 = vshrl.u32 %v859_v35, 16  ;;  %v468_v40 = vshll.u32 %v859_v35, 16  ;;  %v475_v48 = vrot.slane %v473_v41, 2  ;;  %v478_v49 = vrot.slane %v476_v42, 3  ;;  %v1063_v59 = vld [vmem:[%s1230_s1 + $0xd0] sm:$0xff]   ;;  %v1064_v60 = vld [vmem:[%s1230_s1 + $0x88] sm:$0xff]  }
  0x18   : > { %v604_v51 = vrot.slane %v885_v43, 3  ;;  %v1065_v61 = vld [vmem:[%s1230_s1 + $0xc8] sm:$0xff]   ;;  %v1066_v62 = vld [vmem:[%s1230_s1 + $0x80] sm:$0xff]  }
  0x19   : > { %951 = vmatpush3.bf16.msra.mxu0 %v1039_v6  ;;  %v467_v46 = vrot.slane %v465_v39, 2  ;;  %v470_v47 = vrot.slane %v468_v40, 3  ;;  %v479_v53 = vor.u32 %v478_v49, %v475_v48  ;;  %v1067_v63 = vld [vmem:[%s1230_s1 + $0xc0] sm:$0xff]  }
  0x1a   : > { %971 = vmatpush3.bf16.msra.mxu1 %v1040_v7  ;;  %952 = vmatprep.subr.bf16.mxu0 %v1041_v8  ;;  %v606_v54 = vsel %vm603_vm1, %v604_v51, %v605_v44  ;;  %v894_v13 = vld [vmem:[%s1231_s2] ss:$0 sm:$0xff] }
  0x1b   : > { %972 = vmatprep.subr.bf16.mxu1 %v1042_v9  ;;  %v471_v52 = vor.u32 %v470_v47, %v467_v46 }
  0x1d   : > { %953 = vmatpush3.bf16.msra.mxu0 %v1041_v8  ;;  %v480_v56 = vsel %vm463_vm2, %v471_v52, %v479_v53 }
  0x1e   : > { %973 = vmatpush3.bf16.msra.mxu1 %v1042_v9  ;;  %954 = vmatprep.subr.bf16.mxu0 %v1043_v10 }
  0x1f   : > { %974 = vmatprep.subr.bf16.mxu1 %v1044_v11 }
  0x21   : > { %955 = vmatpush3.bf16.msra.mxu0 %v1043_v10 }
  0x22   : > { %975 = vmatpush3.bf16.msra.mxu1 %v1044_v11  ;;  %956 = vmatprep.subr.bf16.mxu0 %v1045_v14 }
  0x23   : > { %976 = vmatprep.subr.bf16.mxu1 %v1046_v15 }
  0x25   : > { %957 = vmatpush3.bf16.msra.mxu0 %v1045_v14 }
  0x26   : > { %977 = vmatpush3.bf16.msra.mxu1 %v1046_v15  ;;  %958 = vmatprep.subr.bf16.mxu0 %v1047_v22 }
  0x27   : > { %978 = vmatprep.subr.bf16.mxu1 %v1048_v23 }
  0x29   : > { %959 = vmatpush3.bf16.msra.mxu0 %v1047_v22 }
  0x2a   : > { %979 = vmatpush3.bf16.msra.mxu1 %v1048_v23  ;;  %984 = vmatprep.subr.bf16.mxu0 %v1052_v26 }
  0x2b   : > { %1004 = vmatprep.subr.bf16.mxu1 %v1053_v28 }
  0x2c   : > { %961 = vmatmul.mubr.bf16.vlgmr.msra.gmra.mxu0 %v232_v29 }
  0x2d   : > { %981 = vmatmul.mubr.bf16.vlgmr.msra.gmra.mxu1 %v1051_v27  ;;  %985 = vmatpush3.bf16.msra.mxu0 %v1052_v26 }
  0x2e   : > { %1005 = vmatpush3.bf16.msra.mxu1 %v1053_v28  ;;  %986 = vmatprep.subr.bf16.mxu0 %v1054_v30 }
  0x2f   : > { %1006 = vmatprep.subr.bf16.mxu1 %v1055_v31  ;;  %1000 = vmatprep.mubr.bf16.mxu0 %v480_v56 }
  0x30   : > { %1020 = vmatprep.mubr.bf16.mxu1 %v606_v54 }
  0x31   : > { %987 = vmatpush3.bf16.msra.mxu0 %v1054_v30 }
  0x32   : > { %1007 = vmatpush3.bf16.msra.mxu1 %v1055_v31  ;;  %988 = vmatprep.subr.bf16.mxu0 %v1056_v32 }
  0x33   : > { %1008 = vmatprep.subr.bf16.mxu1 %v1057_v37 }
  0x35   : > { %989 = vmatpush3.bf16.msra.mxu0 %v1056_v32 }
  0x36   : > { %1009 = vmatpush3.bf16.msra.mxu1 %v1057_v37  ;;  %990 = vmatprep.subr.bf16.mxu0 %v1058_v45 }
  0x37   : > { %1010 = vmatprep.subr.bf16.mxu1 %v1059_v50 }
  0x39   : > { %991 = vmatpush3.bf16.msra.mxu0 %v1058_v45 }
  0x3a   : > { %1011 = vmatpush3.bf16.msra.mxu1 %v1059_v50  ;;  %992 = vmatprep.subr.bf16.mxu0 %v1060_v55 }
  0x3b   : > { %1012 = vmatprep.subr.bf16.mxu1 %v1061_v57 }
  0x3d   : > { %993 = vmatpush3.bf16.msra.mxu0 %v1060_v55 }
  0x3e   : > { %1013 = vmatpush3.bf16.msra.mxu1 %v1061_v57  ;;  %994 = vmatprep.subr.bf16.mxu0 %v1062_v58 }
  0x3f   : > { %1014 = vmatprep.subr.bf16.mxu1 %v1063_v59 }
  0x41   : > { %995 = vmatpush3.bf16.msra.mxu0 %v1062_v58 }
  0x42   : > { %1015 = vmatpush3.bf16.msra.mxu1 %v1063_v59  ;;  %996 = vmatprep.subr.bf16.mxu0 %v1064_v60 }
  0x43   : > { %1016 = vmatprep.subr.bf16.mxu1 %v1065_v61 }
  0x45   : > { %997 = vmatpush3.bf16.msra.mxu0 %v1064_v60 }
  0x46   : > { %1017 = vmatpush3.bf16.msra.mxu1 %v1065_v61  ;;  %998 = vmatprep.subr.bf16.mxu0 %v1066_v62 }
  0x47   : > { %1018 = vmatprep.subr.bf16.mxu1 %v1067_v63 }
  0x49   : > { %999 = vmatpush3.bf16.msra.mxu0 %v1066_v62 }
  0x4a   : > { %1019 = vmatpush3.bf16.msra.mxu1 %v1067_v63 }
  0x4c   : > { %1001 = vmatmul.mubr.bf16.vlgmr.msra.gmra.mxu0 %v479_v53 }
  0x4d   : > { %1021 = vmatmul.mubr.bf16.vlgmr.msra.gmra.mxu1 %v605_v44 }
  0xec   : > { %v962_v0 = vpop.f32.mrf.mxu0 }
  0xed   : > { %v982_v1 = vpop.f32.mrf.mxu1 }
  0xee   : > { %v317_v2 = vpop.f32.mrf.mxu0  ;;  %v427_v7 = vadd.f32 %v982_v1, %v962_v0 }
  0xef   : > { %v418_v3 = vpop.f32.mrf.mxu1 }
  0xf0   : > { %v963_v4 = vpop.f32.mrf.mxu0  ;;  %v419_v10 = vadd.f32 %v418_v3, %v317_v2 }
  0xf1   : > { %v983_v5 = vpop.f32.mrf.mxu1 }
  0xf2   : > { %v320_v6 = vpop.f32.mrf.mxu0 }
  0xf3   : > { %v421_v8 = vpop.f32.mrf.mxu1 }
  0xf4   : > { %v422_v19 = vadd.f32 %v421_v8, %v320_v6 }
 0x10c   : > { %v1002_v9 = vpop.f32.mrf.mxu0 }
 0x10d   : > { %v581_v11 = vadd.f32 %v1002_v9, %v427_v7  ;;  %v1022_v12 = vpop.f32.mrf.mxu1 }
 0x10e   : > { %v565_v14 = vpop.f32.mrf.mxu0 }
 0x10f   : > { %v707_v15 = vadd.f32 %v1022_v12, %v581_v11  ;;  %v579_v16 = vadd.f32 %v565_v14, %v419_v10  ;;  %v691_v17 = vpop.f32.mrf.mxu1 }
 0x110   : > { %v1003_v18 = vpop.f32.mrf.mxu0 }
 0x111   : > { %v717_v20 = vadd.f32 %v894_v13, %v707_v15  ;;  %v705_v21 = vadd.f32 %v691_v17, %v579_v16  ;;  %v1023_v22 = vpop.f32.mrf.mxu1 }
 0x112   : > { %v568_v23 = vpop.f32.mrf.mxu0 }
 0x113   : > { %vm720_vm3 = vcmp.gt.f32.partialorder %v717_v20, 0.0  ;;  %v723_v24 = vmul.f32 0.2, %v717_v20  ;;  %v715_v25 = vadd.f32 %v894_v13, %v705_v21  ;;  %v580_v26 = vadd.f32 %v568_v23, %v422_v19  ;;  %v694_v27 = vpop.f32.mrf.mxu1 }
 0x115   : > { %v726_v28 = vsel %vm720_vm3, %v717_v20, %v723_v24  ;;  %vm718_vm5 = vcmp.gt.f32.partialorder %v715_v25, 0.0  ;;  %v721_v29 = vmul.f32 0.2, %v715_v25  ;;  %v706_v30 = vadd.f32 %v694_v27, %v580_v26 }
 0x116   : > { %v903_v31 = vpack.c.bf16 %v726_v28, %v726_v28 }
 0x117   : > { %v724_v32 = vsel %vm718_vm5, %v715_v25, %v721_v29  ;;  %v716_v33 = vadd.f32 %v894_v13, %v706_v30 }
 0x118   : > { %744 = vst.msk [vmem:[%s170_s11 + $0x8] sm:$0x3] %vm743_vm4, %v903_v31  ;;  %v901_v34 = vpack.c.bf16 %v724_v32, %v724_v32 }
 0x119   : > { %vm719_vm7 = vcmp.gt.f32.partialorder %v716_v33, 0.0  ;;  %v722_v35 = vmul.f32 0.2, %v716_v33 }
 0x11a   : > { %741 = vst.msk [vmem:[%s170_s11] sm:$0xf] %vm740_vm6, %v901_v34 }
 0x11b   : > { %v725_v36 = vsel %vm719_vm7, %v716_v33, %v722_v35 }
 0x11c   : > { %v902_v37 = vpack.c.bf16 %v725_v36, %v725_v36 }
 0x11e   : > { %742 = vst.msk [vmem:[%s170_s11 + $0x4] sm:$0xf] %vm740_vm6, %v902_v37 }
 0x11f PF: > { %s13_s12 = sadd.s32 1, %s1077_s12  }
 0x120   : > { %p10_p4 = scmp.ge.s32.totalorder %s13_s12, 4  }
 0x122   :  { %12 = sbr.rel (!%p10_p4) target bundleno = 1 (0x1), region = 65 }

// kernel: encoder_forward.6
= control target key start
LH: loop header
LB: loop body
LE: loop exit
PB: predicated region body
PF: predicated region fallthrough
CT: control target
= control target key end

     0   :  { %s1357_s12 = smov 0   ;;  %s1584_s0 = inlined_call_operand.vmem [shape: bf16[2,10,256], index: 0, kind: input, shape index: {}]   ;;  %s1585_s1 = inlined_call_operand.vmem [shape: bf16[4,256,128], index: 1, kind: input, shape index: {}]   ;;  %s1586_s2 = inlined_call_operand.vmem [shape: f32[1,128], index: 2, kind: input, shape index: {}]   ;;  %s1587_s3 = inlined_call_operand.vmem [shape: bf16[2,6,128], index: 3, kind: output, shape index: {}]  }
   0x1 LB: > { %s981_s13 = sadd.s32 4294967295, %s1335_s12   ;;  %p985_p0 = scmp.ge.s32.totalorder %s1335_s12, 1  ;;  %s1335_s12 = sphi %s1357_s12, %s13_s12  }
   0x2   : > { %p137_p1 = scmp.lt.s32.totalorder %s1335_s12, 3 }
   0x4   : > { %p138_p2 = pnand %p985_p0, %p137_p1 }
   0x5   : > { %p160_p3 = scmp.lt.s32.totalorder (!%p138_p2), %s981_s13, 1 }
   0x6   : > { %141 = sbr.rel (%p138_p2) target bundleno = 286 (0x11e), region = 32 }
   0xb   : > { %v1257_v0 = vld [vmem:[%s1585_s1 + $0xf8] sm:$0xff]   ;;  %v1261_v4 = vld [vmem:[%s1585_s1 + $0xf0] sm:$0xff]   ;;  %v1265_v8 = vld [vmem:[%s1585_s1 + $0xe8] sm:$0xff]   ;;  %s1589_s13 = smov (!%p160_p3, %s981_s13), 1 }
   0xc   : > { %v1258_v1 = vld [vmem:[%s1585_s1 + $0x78] sm:$0xff]   ;;  %1161 = vmatprep.subr.bf16.mxu0 %v1257_v0  ;;  %v1262_v5 = vld [vmem:[%s1585_s1 + $0x70] sm:$0xff]   ;;  %v1266_v9 = vld [vmem:[%s1585_s1 + $0x68] sm:$0xff]   ;;  %s1160_s18 = sshll.u32 %s1589_s13, 4  ;;  %s988_s24 = sshll.u32 %s1589_s13, 2 }
   0xd   : > { %v1259_v2 = vld [vmem:[%s1585_s1 + $0xb8] sm:$0xff]   ;;  %1183 = vmatprep.subr.bf16.mxu1 %v1258_v1  ;;  %v1263_v6 = vld [vmem:[%s1585_s1 + $0xb0] sm:$0xff]   ;;  %v1267_v10 = vld [vmem:[%s1585_s1 + $0xa8] sm:$0xff]   ;;  %s1465_s27 = scalar_lea.vmem %s1584_s0, %s1160_s18  ;;  %s168_s28 = scalar_lea.vmem %s1587_s3, %s988_s24 }
   0xe   : > { %v1260_v3 = vld [vmem:[%s1585_s1 + $0x38] sm:$0xff]   ;;  %1162 = vmatpush3.bf16.msra.mxu0 %v1259_v2  ;;  %v1264_v7 = vld [vmem:[%s1585_s1 + $0x30] sm:$0xff]   ;;  %v1268_v11 = vld [vmem:[%s1585_s1 + $0x28] sm:$0xff]  }
   0xf   : > { %1184 = vmatpush3.bf16.msra.mxu1 %v1260_v3  ;;  %1163 = vmatprep.subr.bf16.mxu0 %v1261_v4  ;;  %v1269_v12 = vld [vmem:[%s1585_s1 + $0xe0] sm:$0xff]   ;;  %v1273_v16 = vld [vmem:[%s1585_s1 + $0xd8] sm:$0xff]   ;;  %v1277_v20 = vld [vmem:[%s1585_s1 + $0xd0] sm:$0xff]  }
  0x10   : > { %1185 = vmatprep.subr.bf16.mxu1 %v1262_v5  ;;  %v1270_v13 = vld [vmem:[%s1585_s1 + $0x60] sm:$0xff]   ;;  %v1274_v17 = vld [vmem:[%s1585_s1 + $0x58] sm:$0xff]   ;;  %v1278_v21 = vld [vmem:[%s1585_s1 + $0x50] sm:$0xff]  }
  0x11   : > { %v1271_v14 = vld [vmem:[%s1585_s1 + $0xa0] sm:$0xff]   ;;  %v1275_v18 = vld [vmem:[%s1585_s1 + $0x98] sm:$0xff]   ;;  %v1279_v22 = vld [vmem:[%s1585_s1 + $0x90] sm:$0xff]  }
  0x12   : > { %1164 = vmatpush3.bf16.msra.mxu0 %v1263_v6  ;;  %v1272_v15 = vld [vmem:[%s1585_s1 + $0x20] sm:$0xff]   ;;  %v1276_v19 = vld [vmem:[%s1585_s1 + $0x18] sm:$0xff]   ;;  %v1280_v23 = vld [vmem:[%s1585_s1 + $0x10] sm:$0xff]  }
  0x13   : > { %1186 = vmatpush3.bf16.msra.mxu1 %v1264_v7  ;;  %1165 = vmatprep.subr.bf16.mxu0 %v1265_v8  ;;  %v1281_v24 = vld [vmem:[%s1585_s1 + $0xc8] sm:$0xff]   ;;  %v1285_v28 = vld [vmem:[%s1585_s1 + $0xc0] sm:$0xff]   ;;  %v1293_v38 = vld [vmem:[%s1585_s1 + $0x178] sm:$0xff]  }
  0x14   : > { %1187 = vmatprep.subr.bf16.mxu1 %v1266_v9  ;;  %v1282_v25 = vld [vmem:[%s1585_s1 + $0x48] sm:$0xff]   ;;  %v1286_v29 = vld [vmem:[%s1585_s1 + $0x40] sm:$0xff]   ;;  %v1294_v39 = vld [vmem:[%s1585_s1 + $0x1f8] sm:$0xff]  }
  0x15   : > { %v1283_v26 = vld [vmem:[%s1585_s1 + $0x88] sm:$0xff]   ;;  %v1287_v30 = vld [vmem:[%s1585_s1 + $0x80] sm:$0xff]   ;;  %v1295_v46 = vld [vmem:[%s1585_s1 + $0x138] sm:$0xff]  }
  0x16   : > { %1166 = vmatpush3.bf16.msra.mxu0 %v1267_v10  ;;  %v1284_v27 = vld [vmem:[%s1585_s1 + $0x8] sm:$0xff]   ;;  %v1288_v31 = vld [vmem:[%s1585_s1] sm:$0xff]   ;;  %v1296_v47 = vld [vmem:[%s1585_s1 + $0x1b8] sm:$0xff]  }
  0x17   : > { %1188 = vmatpush3.bf16.msra.mxu1 %v1268_v11  ;;  %1167 = vmatprep.subr.bf16.mxu0 %v1269_v12  ;;  %v203_v32 = vld [vmem:[%s1465_s27] sm:$0xff]  ;;  %v1298_v50 = vld [vmem:[%s1585_s1 + $0x1f0] sm:$0xff]   ;;  %v1302_v54 = vld [vmem:[%s1585_s1 + $0x1e8] sm:$0xff]  }
  0x18   : > { %1189 = vmatprep.subr.bf16.mxu1 %v1270_v13  ;;  %v170_v33 = vld [vmem:[%s1465_s27] sm:$0x77]  ;;  %v1021_v34 = vcombine.low %v203_v32, %v203_v32  ;;  %v1022_v35 = vcombine.high %v203_v32, %v203_v32  ;;  %v1297_v51 = vld [vmem:[%s1585_s1 + $0x170] sm:$0xff]   ;;  %v1301_v55 = vld [vmem:[%s1585_s1 + $0x168] sm:$0xff]  }
  0x19   : > { %v1039_v36 = vcombine.low %v170_v33, %v170_v33  ;;  %v1040_v37 = vcombine.high %v170_v33, %v170_v33  ;;  %v1300_v52 = vld [vmem:[%s1585_s1 + $0x1b0] sm:$0xff]   ;;  %v1304_v56 = vld [vmem:[%s1585_s1 + $0x1a8] sm:$0xff]   ;;  %v1306_v58 = vld [vmem:[%s1585_s1 + $0x1e0] sm:$0xff]  }
  0x1a   : > { %1168 = vmatpush3.bf16.msra.mxu0 %v1271_v14  ;;  %v250_v40 = vshrl.u32 %v1022_v35, 16  ;;  %v252_v41 = vshll.u32 %v1022_v35, 16  ;;  %v243_v42 = vshrl.u32 %v1021_v34, 16  ;;  %v245_v43 = vshll.u32 %v1021_v34, 16  ;;  %v1299_v53 = vld [vmem:[%s1585_s1 + $0x130] sm:$0xff]   ;;  %v1303_v57 = vld [vmem:[%s1585_s1 + $0x128] sm:$0xff]  }
  0x1b   : > { %1190 = vmatpush3.bf16.msra.mxu1 %v1272_v15  ;;  %1169 = vmatprep.subr.bf16.mxu0 %v1273_v16  ;;  %v1305_v59 = vld [vmem:[%s1585_s1 + $0x160] sm:$0xff]   ;;  %v1310_v62 = vld [vmem:[%s1585_s1 + $0x1d8] sm:$0xff]   ;;  %v1314_v2 = vld [vmem:[%s1585_s1 + $0x1d0] sm:$0xff]  }
  0x1c   : > { %1191 = vmatprep.subr.bf16.mxu1 %v1274_v17  ;;  %529 = vmatprep.mubr.bf16.mxu1 %v1040_v37  ;;  %v254_v44 = vrot.slane %v252_v41, 1  ;;  %v247_v45 = vrot.slane %v245_v43, 1  ;;  %v1308_v60 = vld [vmem:[%s1585_s1 + $0x1a0] sm:$0xff]   ;;  %v1309_v63 = vld [vmem:[%s1585_s1 + $0x158] sm:$0xff]   ;;  %v1313_v3 = vld [vmem:[%s1585_s1 + $0x150] sm:$0xff]  }
  0x1d   : > { %v1307_v61 = vld [vmem:[%s1585_s1 + $0x120] sm:$0xff]   ;;  %v1312_v0 = vld [vmem:[%s1585_s1 + $0x198] sm:$0xff]   ;;  %v1316_v4 = vld [vmem:[%s1585_s1 + $0x190] sm:$0xff]  }
  0x1e   : > { %1170 = vmatpush3.bf16.msra.mxu0 %v1275_v18  ;;  %v255_v48 = vor.u32 %v254_v44, %v250_v40  ;;  %v248_v49 = vor.u32 %v247_v45, %v243_v42  ;;  %v1311_v1 = vld [vmem:[%s1585_s1 + $0x118] sm:$0xff]   ;;  %v1315_v5 = vld [vmem:[%s1585_s1 + $0x110] sm:$0xff]   ;;  %v1318_v6 = vld [vmem:[%s1585_s1 + $0x1c8] sm:$0xff]  }
  0x1f   : > { %1192 = vmatpush3.bf16.msra.mxu1 %v1276_v19  ;;  %1171 = vmatprep.subr.bf16.mxu0 %v1277_v20  ;;  %v1317_v7 = vld [vmem:[%s1585_s1 + $0x148] sm:$0xff]   ;;  %v1322_v10 = vld [vmem:[%s1585_s1 + $0x1c0] sm:$0xff]  }
  0x20   : > { %1193 = vmatprep.subr.bf16.mxu1 %v1278_v21  ;;  %386 = vmatprep.mubr.bf16.mxu0 %v255_v48  ;;  %v1320_v8 = vld [vmem:[%s1585_s1 + $0x188] sm:$0xff]   ;;  %v1321_v11 = vld [vmem:[%s1585_s1 + $0x140] sm:$0xff]  }
  0x21   : > { %v1319_v9 = vld [vmem:[%s1585_s1 + $0x108] sm:$0xff]   ;;  %v1324_v12 = vld [vmem:[%s1585_s1 + $0x180] sm:$0xff]  }
  0x22   : > { %1172 = vmatpush3.bf16.msra.mxu0 %v1279_v22  ;;  %v537_v13 = vld [vmem:[%s1465_s27] sm:$0xee]  ;;  %v538_v14 = vld [vmem:[%s1465_s27 + $0x8] sm:$0x11] }
  0x23   : > { %1194 = vmatpush3.bf16.msra.mxu1 %v1280_v23  ;;  %1173 = vmatprep.subr.bf16.mxu0 %v1281_v24  ;;  %v1089_v15 = vcombine.low %v537_v13, %v538_v14  ;;  %v1090_v16 = vcombine.high %v537_v13, %v538_v14  ;;  %v735_v17 = vld [vmem:[%s1465_s27] sm:$0xcc] }
  0x24   : > { %1195 = vmatprep.subr.bf16.mxu1 %v1282_v25  ;;  %v1323_v18 = vld [vmem:[%s1585_s1 + $0x100] sm:$0xff]   ;;  %v1139_v19 = vcombine.low %v735_v17, %v538_v14  ;;  %v1140_v20 = vcombine.high %v735_v17, %v538_v14 }
  0x25   : > { %v589_v21 = vshrl.u32 %v1090_v16, 16  ;;  %v592_v22 = vshll.u32 %v1090_v16, 16  ;;  %v581_v23 = vshrl.u32 %v1089_v15, 16  ;;  %v584_v24 = vshll.u32 %v1089_v15, 16 }
  0x26   : > { %1174 = vmatpush3.bf16.msra.mxu0 %v1283_v26  ;;  %v774_v25 = vrot.slane %v1139_v19, 2  ;;  %v775_v26 = vrot.slane %v1140_v20, 2 }
  0x27   : > { %1196 = vmatpush3.bf16.msra.mxu1 %v1284_v27  ;;  %1175 = vmatprep.subr.bf16.mxu0 %v1285_v28  ;;  %v591_v27 = vrot.slane %v589_v21, 1  ;;  %v594_v28 = vrot.slane %v592_v22, 2 }
  0x28   : > { %1197 = vmatprep.subr.bf16.mxu1 %v1286_v29  ;;  %v583_v29 = vrot.slane %v581_v23, 1 }
  0x2a   : > { %1176 = vmatpush3.bf16.msra.mxu0 %v1287_v30  ;;  %v586_v30 = vrot.slane %v584_v24, 2 }
  0x2b   : > { %1198 = vmatpush3.bf16.msra.mxu1 %v1288_v31  ;;  %1205 = vmatprep.subr.bf16.mxu0 %v1293_v38  ;;  %v595_v31 = vor.u32 %v594_v28, %v591_v27 }
  0x2c   : > { %1227 = vmatprep.subr.bf16.mxu1 %v1294_v39  ;;  %v587_v32 = vor.u32 %v586_v30, %v583_v29 }
  0x2d   : > { %387 = vmatmul.mubr.bf16.vlgmr.msra.gmra.mxu0 %v248_v49 }
  0x2e   : > { %530 = vmatmul.mubr.bf16.vlgmr.msra.gmra.mxu1 %v1039_v36  ;;  %1206 = vmatpush3.bf16.msra.mxu0 %v1295_v46 }
  0x2f   : > { %1228 = vmatpush3.bf16.msra.mxu1 %v1296_v47  ;;  %1207 = vmatprep.subr.bf16.mxu0 %v1297_v51 }
  0x30   : > { %1229 = vmatprep.subr.bf16.mxu1 %v1298_v50  ;;  %906 = vmatprep.mubr.bf16.mxu1 %v775_v26 }
  0x31   : > { %726 = vmatprep.mubr.bf16.mxu0 %v595_v31 }
  0x32   : > { %1208 = vmatpush3.bf16.msra.mxu0 %v1299_v53 }
  0x33   : > { %1230 = vmatpush3.bf16.msra.mxu1 %v1300_v52  ;;  %1209 = vmatprep.subr.bf16.mxu0 %v1301_v55 }
  0x34   : > { %1231 = vmatprep.subr.bf16.mxu1 %v1302_v54  ;;  %v1157_v54 = vld [vmem:[%s1586_s2] ss:$0 sm:$0xff] }
  0x36   : > { %1210 = vmatpush3.bf16.msra.mxu0 %v1303_v57 }
  0x37   : > { %1232 = vmatpush3.bf16.msra.mxu1 %v1304_v56  ;;  %1211 = vmatprep.subr.bf16.mxu0 %v1305_v59 }
  0x38   : > { %1233 = vmatprep.subr.bf16.mxu1 %v1306_v58 }
  0x3a   : > { %1212 = vmatpush3.bf16.msra.mxu0 %v1307_v61 }
  0x3b   : > { %1234 = vmatpush3.bf16.msra.mxu1 %v1308_v60  ;;  %1213 = vmatprep.subr.bf16.mxu0 %v1309_v63 }
  0x3c   : > { %1235 = vmatprep.subr.bf16.mxu1 %v1310_v62 }
  0x3e   : > { %1214 = vmatpush3.bf16.msra.mxu0 %v1311_v1 }
  0x3f   : > { %1236 = vmatpush3.bf16.msra.mxu1 %v1312_v0  ;;  %1215 = vmatprep.subr.bf16.mxu0 %v1313_v3 }
  0x40   : > { %1237 = vmatprep.subr.bf16.mxu1 %v1314_v2 }
  0x42   : > { %1216 = vmatpush3.bf16.msra.mxu0 %v1315_v5 }
  0x43   : > { %1238 = vmatpush3.bf16.msra.mxu1 %v1316_v4  ;;  %1217 = vmatprep.subr.bf16.mxu0 %v1317_v7 }
  0x44   : > { %1239 = vmatprep.subr.bf16.mxu1 %v1318_v6 }
  0x46   : > { %1218 = vmatpush3.bf16.msra.mxu0 %v1319_v9 }
  0x47   : > { %1240 = vmatpush3.bf16.msra.mxu1 %v1320_v8  ;;  %1219 = vmatprep.subr.bf16.mxu0 %v1321_v11 }
  0x48   : > { %1241 = vmatprep.subr.bf16.mxu1 %v1322_v10 }
  0x4a   : > { %1220 = vmatpush3.bf16.msra.mxu0 %v1323_v18 }
  0x4b   : > { %1242 = vmatpush3.bf16.msra.mxu1 %v1324_v12 }
  0x4d   : > { %727 = vmatmul.mubr.bf16.vlgmr.msra.gmra.mxu0 %v587_v32 }
  0x4e   : > { %907 = vmatmul.mubr.bf16.vlgmr.msra.gmra.mxu1 %v774_v25 }
  0xed   : > { %v1177_v36 = vpop.f32.mrf.mxu0 }
  0xee   : > { %v1199_v33 = vpop.f32.mrf.mxu1 }
  0xef   : > { %v1178_v38 = vpop.f32.mrf.mxu0 }
  0xf0   : > { %v1200_v34 = vpop.f32.mrf.mxu1  ;;  %v1179_v42 = vadd.f32 %v1178_v38, %v1177_v36 }
  0xf1   : > { %v1180_v39 = vpop.f32.mrf.mxu0  ;;  %v1201_v43 = vadd.f32 %v1200_v34, %v1199_v33 }
  0xf2   : > { %v1202_v35 = vpop.f32.mrf.mxu1 }
  0xf3   : > { %v1181_v40 = vpop.f32.mrf.mxu0  ;;  %v532_v48 = vadd.f32 %v1201_v43, %v1179_v42 }
  0xf4   : > { %v1203_v37 = vpop.f32.mrf.mxu1 }
 0x10d   : > { %v1221_v45 = vpop.f32.mrf.mxu0 }
 0x10e   : > { %v1243_v41 = vpop.f32.mrf.mxu1 }
 0x10f   : > { %v1222_v47 = vpop.f32.mrf.mxu0 }
 0x110   : > { %v1244_v44 = vpop.f32.mrf.mxu1  ;;  %v1223_v49 = vadd.f32 %v1222_v47, %v1221_v45 }
 0x111   : > { %v1224_v51 = vpop.f32.mrf.mxu0  ;;  %v1245_v53 = vadd.f32 %v1244_v44, %v1243_v41 }
 0x112   : > { %v1246_v46 = vpop.f32.mrf.mxu1  ;;  %v734_v52 = vadd.f32 %v1223_v49, %v532_v48 }
 0x113   : > { %v1225_v55 = vpop.f32.mrf.mxu0 }
 0x114   : > { %v1247_v50 = vpop.f32.mrf.mxu1  ;;  %v914_v56 = vadd.f32 %v1245_v53, %v734_v52 }
 0x116   : > { %v922_v57 = vadd.f32 %v1157_v54, %v914_v56 }
 0x118   : > { %vm923_vm0 = vcmp.gt.f32.partialorder %v922_v57, 0.0  ;;  %v924_v58 = vmul.f32 0.2, %v922_v57 }
 0x11a   : > { %v925_v59 = vsel %vm923_vm0, %v922_v57, %v924_v58 }
 0x11b   : > { %v926_v60 = vpack.c.bf16 %v925_v59, %v925_v59 }
 0x11d   : > { %927 = vst [vmem:[%s168_s28] sm:$0x7] %v926_v60 }
 0x11e PF: > { %s13_s12 = sadd.s32 1, %s1335_s12  }
 0x11f   : > { %p10_p4 = scmp.ge.s32.totalorder %s13_s12, 4  }
 0x121   :  { %12 = sbr.rel (!%p10_p4) target bundleno = 1 (0x1), region = 65 }

// kernel: encoder_forward.7
= control target key start
LH: loop header
LB: loop body
LE: loop exit
PB: predicated region body
PF: predicated region fallthrough
CT: control target
= control target key end

     0   :  { %s3177_s12 = smov 0   ;;  %s4019_s0 = inlined_call_operand.vmem [shape: bf16[2,5,512], index: 0, kind: input, shape index: {}]   ;;  %s4020_s1 = inlined_call_operand.vmem [shape: bf16[4,512,256], index: 1, kind: input, shape index: {}]   ;;  %s4021_s2 = inlined_call_operand.vmem [shape: f32[1,256], index: 2, kind: input, shape index: {}]   ;;  %s4022_s3 = inlined_call_operand.vmem [shape: bf16[2,2,256], index: 3, kind: output, shape index: {}]  }
   0x1 LB: > { %s2262_s13 = sadd.s32 4294967295, %s3154_s12   ;;  %p2266_p0 = scmp.ge.s32.totalorder %s3154_s12, 1  ;;  %s3154_s12 = sphi %s3177_s12, %s13_s12  }
   0x2   : > { %p137_p1 = scmp.lt.s32.totalorder %s3154_s12, 3 }
   0x4   : > { %p138_p2 = pnand %p2266_p0, %p137_p1 }
   0x5   : > { %p160_p3 = scmp.lt.s32.totalorder (!%p138_p2), %s2262_s13, 1 }
   0x6   : > { %141 = sbr.rel (%p138_p2) target bundleno = 478 (0x1de), region = 32 }
   0xb   : > { %v2748_v0 = vld [vmem:[%s4020_s1 + $0x274] ss:$8 sps:$4 sm:$0xff]   ;;  %v2752_v2 = vld [vmem:[%s4020_s1 + $0x270] ss:$8 sps:$4 sm:$0xff]   ;;  %v2754_v4 = vld [vmem:[%s4020_s1 + $0x264] ss:$8 sps:$4 sm:$0xff]  }
   0xc   : > { %v2750_v1 = vld [vmem:[%s4020_s1 + $0x374] ss:$8 sps:$4 sm:$0xff]   ;;  %664 = vmatprep.subr.bf16.mxu0 %v2748_v0  ;;  %v2753_v3 = vld [vmem:[%s4020_s1 + $0x370] ss:$8 sps:$4 sm:$0xff]   ;;  %v2756_v5 = vld [vmem:[%s4020_s1 + $0x364] ss:$8 sps:$4 sm:$0xff]  }
   0xd   : > { %705 = vmatprep.subr.bf16.mxu1 %v2750_v1  ;;  %665 = vmatpush1.bf16.msra.mxu0 %v2752_v2  ;;  %v2758_v6 = vld [vmem:[%s4020_s1 + $0x260] ss:$8 sps:$4 sm:$0xff]   ;;  %v2760_v8 = vld [vmem:[%s4020_s1 + $0x254] ss:$8 sps:$4 sm:$0xff]   ;;  %v2764_v10 = vld [vmem:[%s4020_s1 + $0x250] ss:$8 sps:$4 sm:$0xff]  }
   0xe   : > { %706 = vmatpush1.bf16.msra.mxu1 %v2753_v3  ;;  %666 = vmatprep.subr.bf16.mxu0 %v2754_v4  ;;  %v2759_v7 = vld [vmem:[%s4020_s1 + $0x360] ss:$8 sps:$4 sm:$0xff]   ;;  %v2762_v9 = vld [vmem:[%s4020_s1 + $0x354] ss:$8 sps:$4 sm:$0xff]   ;;  %v2765_v11 = vld [vmem:[%s4020_s1 + $0x350] ss:$8 sps:$4 sm:$0xff]  }
   0xf   : > { %707 = vmatprep.subr.bf16.mxu1 %v2756_v5  ;;  %v2766_v12 = vld [vmem:[%s4020_s1 + $0x244] ss:$8 sps:$4 sm:$0xff]   ;;  %v2770_v14 = vld [vmem:[%s4020_s1 + $0x240] ss:$8 sps:$4 sm:$0xff]   ;;  %v2772_v16 = vld [vmem:[%s4020_s1 + $0x234] ss:$8 sps:$4 sm:$0xff]  }
  0x10   : > { %v2768_v13 = vld [vmem:[%s4020_s1 + $0x344] ss:$8 sps:$4 sm:$0xff]   ;;  %v2771_v15 = vld [vmem:[%s4020_s1 + $0x340] ss:$8 sps:$4 sm:$0xff]   ;;  %v2774_v17 = vld [vmem:[%s4020_s1 + $0x334] ss:$8 sps:$4 sm:$0xff]  }
  0x11   : > { %667 = vmatpush1.bf16.msra.mxu0 %v2758_v6  ;;  %v2776_v18 = vld [vmem:[%s4020_s1 + $0x230] ss:$8 sps:$4 sm:$0xff]   ;;  %v2778_v20 = vld [vmem:[%s4020_s1 + $0x224] ss:$8 sps:$4 sm:$0xff]   ;;  %v2782_v22 = vld [vmem:[%s4020_s1 + $0x220] ss:$8 sps:$4 sm:$0xff]  }
  0x12   : > { %708 = vmatpush1.bf16.msra.mxu1 %v2759_v7  ;;  %668 = vmatprep.subr.bf16.mxu0 %v2760_v8  ;;  %v2777_v19 = vld [vmem:[%s4020_s1 + $0x330] ss:$8 sps:$4 sm:$0xff]   ;;  %v2780_v21 = vld [vmem:[%s4020_s1 + $0x324] ss:$8 sps:$4 sm:$0xff]   ;;  %v2783_v23 = vld [vmem:[%s4020_s1 + $0x320] ss:$8 sps:$4 sm:$0xff]  }
  0x13   : > { %709 = vmatprep.subr.bf16.mxu1 %v2762_v9  ;;  %v2784_v24 = vld [vmem:[%s4020_s1 + $0x214] ss:$8 sps:$4 sm:$0xff]   ;;  %v2788_v26 = vld [vmem:[%s4020_s1 + $0x210] ss:$8 sps:$4 sm:$0xff]   ;;  %v2790_v28 = vld [vmem:[%s4020_s1 + $0x204] ss:$8 sps:$4 sm:$0xff]  }
  0x14   : > { %v2786_v25 = vld [vmem:[%s4020_s1 + $0x314] ss:$8 sps:$4 sm:$0xff]   ;;  %v2789_v27 = vld [vmem:[%s4020_s1 + $0x310] ss:$8 sps:$4 sm:$0xff]   ;;  %v2792_v29 = vld [vmem:[%s4020_s1 + $0x304] ss:$8 sps:$4 sm:$0xff]  }
  0x15   : > { %669 = vmatpush1.bf16.msra.mxu0 %v2764_v10  ;;  %v2794_v30 = vld [vmem:[%s4020_s1 + $0x200] ss:$8 sps:$4 sm:$0xff]   ;;  %v2796_v32 = vld [vmem:[%s4020_s1 + $0x2f4] ss:$8 sps:$4 sm:$0xff]   ;;  %v2800_v34 = vld [vmem:[%s4020_s1 + $0x2f0] ss:$8 sps:$4 sm:$0xff]  }
  0x16   : > { %710 = vmatpush1.bf16.msra.mxu1 %v2765_v11  ;;  %670 = vmatprep.subr.bf16.mxu0 %v2766_v12  ;;  %v2795_v31 = vld [vmem:[%s4020_s1 + $0x300] ss:$8 sps:$4 sm:$0xff]   ;;  %v2798_v33 = vld [vmem:[%s4020_s1 + $0x3f4] ss:$8 sps:$4 sm:$0xff]   ;;  %v2801_v35 = vld [vmem:[%s4020_s1 + $0x3f0] ss:$8 sps:$4 sm:$0xff]  }
  0x17   : > { %711 = vmatprep.subr.bf16.mxu1 %v2768_v13  ;;  %v2802_v36 = vld [vmem:[%s4020_s1 + $0x2e4] ss:$8 sps:$4 sm:$0xff]   ;;  %s4024_s13 = smov (!%p160_p3, %s2262_s13), 1  ;;  %v2806_v38 = vld [vmem:[%s4020_s1 + $0x2e0] ss:$8 sps:$4 sm:$0xff]  }
  0x18   : > { %v2804_v37 = vld [vmem:[%s4020_s1 + $0x3e4] ss:$8 sps:$4 sm:$0xff]   ;;  %v2807_v39 = vld [vmem:[%s4020_s1 + $0x3e0] ss:$8 sps:$4 sm:$0xff]   ;;  %v2808_v40 = vld [vmem:[%s4020_s1 + $0x2d4] ss:$8 sps:$4 sm:$0xff]  }
  0x19   : > { %671 = vmatpush1.bf16.msra.mxu0 %v2770_v14  ;;  %s2738_s21 = sshll.u32 %s4024_s13, 4  ;;  %v2810_v41 = vld [vmem:[%s4020_s1 + $0x3d4] ss:$8 sps:$4 sm:$0xff]   ;;  %v2812_v42 = vld [vmem:[%s4020_s1 + $0x2d0] ss:$8 sps:$4 sm:$0xff]   ;;  %s2269_s18 = sshll.u32 %s4024_s13, 1 }
  0x1a   : > { %712 = vmatpush1.bf16.msra.mxu1 %v2771_v15  ;;  %672 = vmatprep.subr.bf16.mxu0 %v2772_v16  ;;  %v2813_v43 = vld [vmem:[%s4020_s1 + $0x3d0] ss:$8 sps:$4 sm:$0xff]   ;;  %s3327_s30 = scalar_lea.vmem %s4019_s0, %s2738_s21  ;;  %v2814_v44 = vld [vmem:[%s4020_s1 + $0x2c4] ss:$8 sps:$4 sm:$0xff]   ;;  %v2818_v46 = vld [vmem:[%s4020_s1 + $0x2c0] ss:$8 sps:$4 sm:$0xff]   ;;  %s168_s21 = scalar_lea.vmem %s4022_s3, %s2269_s18 }
  0x1b   : > { %713 = vmatprep.subr.bf16.mxu1 %v2774_v17  ;;  %v2816_v45 = vld [vmem:[%s4020_s1 + $0x3c4] ss:$8 sps:$4 sm:$0xff]   ;;  %v2819_v50 = vld [vmem:[%s4020_s1 + $0x3c0] ss:$8 sps:$4 sm:$0xff]   ;;  %v2820_v51 = vld [vmem:[%s4020_s1 + $0x2b4] ss:$8 sps:$4 sm:$0xff]  }
  0x1c   : > { %v235_v47 = vld [vmem:[%s3327_s30] sm:$0x33]  ;;  %v236_v49 = vld [vmem:[%s3327_s30 + $0x8] sm:$0x33]  ;;  %v2822_v53 = vld [vmem:[%s4020_s1 + $0x3b4] ss:$8 sps:$4 sm:$0xff]  }
  0x1d   : > { %673 = vmatpush1.bf16.msra.mxu0 %v2776_v18  ;;  %v2335_v48 = vcombine.high %v235_v47, %v235_v47  ;;  %v2337_v52 = vcombine.high %v236_v49, %v236_v49  ;;  %v2824_v59 = vld [vmem:[%s4020_s1 + $0x2b0] ss:$8 sps:$4 sm:$0xff]   ;;  %v2826_v62 = vld [vmem:[%s4020_s1 + $0x2a4] ss:$8 sps:$4 sm:$0xff]   ;;  %v2334_v2 = vcombine.low %v235_v47, %v235_v47  ;;  %v2336_v3 = vcombine.low %v236_v49, %v236_v49  ;;  %v2830_v4 = vld [vmem:[%s4020_s1 + $0x2a0] ss:$8 sps:$4 sm:$0xff]  }
  0x1e   : > { %714 = vmatpush1.bf16.msra.mxu1 %v2777_v19  ;;  %674 = vmatprep.subr.bf16.mxu0 %v2778_v20  ;;  %v2825_v60 = vld [vmem:[%s4020_s1 + $0x3b0] ss:$8 sps:$4 sm:$0xff]   ;;  %v2828_v63 = vld [vmem:[%s4020_s1 + $0x3a4] ss:$8 sps:$4 sm:$0xff]   ;;  %v2831_v5 = vld [vmem:[%s4020_s1 + $0x3a0] ss:$8 sps:$4 sm:$0xff]  }
  0x1f   : > { %715 = vmatprep.subr.bf16.mxu1 %v2780_v21  ;;  %v320_v54 = vshrl.u32 %v2335_v48, 16  ;;  %v322_v55 = vshll.u32 %v2335_v48, 16  ;;  %v334_v56 = vshrl.u32 %v2337_v52, 16  ;;  %v336_v57 = vshll.u32 %v2337_v52, 16  ;;  %v2832_v6 = vld [vmem:[%s4020_s1 + $0x294] ss:$8 sps:$4 sm:$0xff]  }
  0x20   : > { %v2834_v7 = vld [vmem:[%s4020_s1 + $0x394] ss:$8 sps:$4 sm:$0xff]   ;;  %v315_v8 = vshll.u32 %v2334_v2, 16  ;;  %v329_v9 = vshll.u32 %v2336_v3, 16  ;;  %v2836_v10 = vld [vmem:[%s4020_s1 + $0x290] ss:$8 sps:$4 sm:$0xff]  }
  0x21   : > { %675 = vmatpush1.bf16.msra.mxu0 %v2782_v22  ;;  %v324_v58 = vrot.slane %v322_v55, 1  ;;  %v338_v61 = vrot.slane %v336_v57, 1  ;;  %v2837_v11 = vld [vmem:[%s4020_s1 + $0x390] ss:$8 sps:$4 sm:$0xff]   ;;  %v2838_v12 = vld [vmem:[%s4020_s1 + $0x284] ss:$8 sps:$4 sm:$0xff]  }
  0x22   : > { %716 = vmatpush1.bf16.msra.mxu1 %v2783_v23  ;;  %676 = vmatprep.subr.bf16.mxu0 %v2784_v24  ;;  %v2840_v13 = vld [vmem:[%s4020_s1 + $0x384] ss:$8 sps:$4 sm:$0xff]   ;;  %v313_v14 = vshrl.u32 %v2334_v2, 16  ;;  %v317_v15 = vrot.slane %v315_v8, 1  ;;  %v327_v16 = vshrl.u32 %v2336_v3, 16  ;;  %v331_v17 = vrot.slane %v329_v9, 1 }
  0x23   : > { %717 = vmatprep.subr.bf16.mxu1 %v2786_v25  ;;  %v325_v0 = vor.u32 %v324_v58, %v320_v54  ;;  %v339_v1 = vor.u32 %v338_v61, %v334_v56  ;;  %v2842_v18 = vld [vmem:[%s4020_s1 + $0x280] ss:$8 sps:$4 sm:$0xff]   ;;  %v2850_v20 = vld [vmem:[%s4020_s1 + $0x74] ss:$8 sps:$4 sm:$0xff]   ;;  %v2848_v24 = vld [vmem:[%s4020_s1 + $0x70] ss:$8 sps:$4 sm:$0xff]  }
  0x24   : > { %v2843_v19 = vld [vmem:[%s4020_s1 + $0x380] ss:$8 sps:$4 sm:$0xff]   ;;  %v2853_v21 = vld [vmem:[%s4020_s1 + $0x174] ss:$8 sps:$4 sm:$0xff]   ;;  %v318_v22 = vor.u32 %v317_v15, %v313_v14  ;;  %v332_v23 = vor.u32 %v331_v17, %v327_v16  ;;  %v2851_v25 = vld [vmem:[%s4020_s1 + $0x170] ss:$8 sps:$4 sm:$0xff]  }
  0x25   : > { %677 = vmatpush1.bf16.msra.mxu0 %v2788_v26  ;;  %696 = vmatprep.mubr.bf16.mxu0 %v325_v0  ;;  %v2856_v26 = vld [vmem:[%s4020_s1 + $0x64] ss:$8 sps:$4 sm:$0xff]   ;;  %v2889_v47 = vld [vmem:[%s4020_s1 + $0x114] ss:$8 sps:$4 sm:$0xff]   ;;  %v2884_v48 = vld [vmem:[%s4020_s1 + $0x10] ss:$8 sps:$4 sm:$0xff]  }
  0x26   : > { %718 = vmatpush1.bf16.msra.mxu1 %v2789_v27  ;;  %678 = vmatprep.subr.bf16.mxu0 %v2790_v28  ;;  %v2859_v27 = vld [vmem:[%s4020_s1 + $0x164] ss:$8 sps:$4 sm:$0xff]   ;;  %v2854_v28 = vld [vmem:[%s4020_s1 + $0x60] ss:$8 sps:$4 sm:$0xff]   ;;  %v2887_v49 = vld [vmem:[%s4020_s1 + $0x110] ss:$8 sps:$4 sm:$0xff]  }
  0x27   : > { %719 = vmatprep.subr.bf16.mxu1 %v2792_v29  ;;  %737 = vmatprep.mubr.bf16.mxu1 %v339_v1  ;;  %v2857_v29 = vld [vmem:[%s4020_s1 + $0x160] ss:$8 sps:$4 sm:$0xff]   ;;  %v2892_v52 = vld [vmem:[%s4020_s1 + $0x4] ss:$8 sps:$4 sm:$0xff]   ;;  %v2898_v58 = vld [vmem:[%s4020_s1 + $0xf4] ss:$8 sps:$4 sm:$0xff]  }
  0x28   : > { %v2895_v54 = vld [vmem:[%s4020_s1 + $0x104] ss:$8 sps:$4 sm:$0xff]   ;;  %v2890_v56 = vld [vmem:[%s4020_s1] ss:$8 sps:$4 sm:$0xff]   ;;  %v2899_v61 = vld [vmem:[%s4020_s1 + $0x1f0] ss:$8 sps:$4 sm:$0xff]  }
  0x29   : > { %679 = vmatpush1.bf16.msra.mxu0 %v2794_v30  ;;  %v2862_v30 = vld [vmem:[%s4020_s1 + $0x54] ss:$8 sps:$4 sm:$0xff]   ;;  %v2893_v57 = vld [vmem:[%s4020_s1 + $0x100] ss:$8 sps:$4 sm:$0xff]   ;;  %v2928_v14 = vld [vmem:[%s4020_s1 + $0xa4] ss:$8 sps:$4 sm:$0xff]  }
  0x2a   : > { %720 = vmatpush1.bf16.msra.mxu1 %v2795_v31  ;;  %680 = vmatprep.subr.bf16.mxu0 %v2796_v32  ;;  %v2865_v31 = vld [vmem:[%s4020_s1 + $0x154] ss:$8 sps:$4 sm:$0xff]   ;;  %v2860_v32 = vld [vmem:[%s4020_s1 + $0x50] ss:$8 sps:$4 sm:$0xff]   ;;  %v2902_v0 = vld [vmem:[%s4020_s1 + $0xe0] ss:$8 sps:$4 sm:$0xff]  }
  0x2b   : > { %721 = vmatprep.subr.bf16.mxu1 %v2798_v33  ;;  %v2863_v33 = vld [vmem:[%s4020_s1 + $0x150] ss:$8 sps:$4 sm:$0xff]   ;;  %v2905_v1 = vld [vmem:[%s4020_s1 + $0x1e0] ss:$8 sps:$4 sm:$0xff]   ;;  %v2910_v2 = vld [vmem:[%s4020_s1 + $0xd4] ss:$8 sps:$4 sm:$0xff]  }
  0x2c   : > { %v2913_v3 = vld [vmem:[%s4020_s1 + $0x1d4] ss:$8 sps:$4 sm:$0xff]   ;;  %v2914_v8 = vld [vmem:[%s4020_s1 + $0xc0] ss:$8 sps:$4 sm:$0xff]   ;;  %v2931_v15 = vld [vmem:[%s4020_s1 + $0x1a4] ss:$8 sps:$4 sm:$0xff]  }
  0x2d   : > { %681 = vmatpush2.bf16.msra.mxu0 %v2800_v34  ;;  %v2868_v34 = vld [vmem:[%s4020_s1 + $0x44] ss:$8 sps:$4 sm:$0xff]   ;;  %v2917_v9 = vld [vmem:[%s4020_s1 + $0x1c0] ss:$8 sps:$4 sm:$0xff]  }
  0x2e   : > { %722 = vmatpush2.bf16.msra.mxu1 %v2801_v35  ;;  %682 = vmatprep.subr.bf16.mxu0 %v2802_v36  ;;  %v2871_v35 = vld [vmem:[%s4020_s1 + $0x144] ss:$8 sps:$4 sm:$0xff]   ;;  %v2866_v36 = vld [vmem:[%s4020_s1 + $0x40] ss:$8 sps:$4 sm:$0xff]  }
  0x2f   : > { %723 = vmatprep.subr.bf16.mxu1 %v2804_v37  ;;  %v2869_v37 = vld [vmem:[%s4020_s1 + $0x140] ss:$8 sps:$4 sm:$0xff]  }
  0x30   : > { %v2926_v16 = vld [vmem:[%s4020_s1 + $0xa0] ss:$8 sps:$4 sm:$0xff]  }
  0x31   : > { %683 = vmatpush2.bf16.msra.mxu0 %v2806_v38  ;;  %v2874_v38 = vld [vmem:[%s4020_s1 + $0x34] ss:$8 sps:$4 sm:$0xff]   ;;  %v2929_v17 = vld [vmem:[%s4020_s1 + $0x1a0] ss:$8 sps:$4 sm:$0xff]  }
  0x32   : > { %724 = vmatpush2.bf16.msra.mxu1 %v2807_v39  ;;  %684 = vmatprep.subr.bf16.mxu0 %v2808_v40  ;;  %v2877_v39 = vld [vmem:[%s4020_s1 + $0x134] ss:$8 sps:$4 sm:$0xff]   ;;  %v2872_v40 = vld [vmem:[%s4020_s1 + $0x30] ss:$8 sps:$4 sm:$0xff]  }
  0x33   : > { %725 = vmatprep.subr.bf16.mxu1 %v2810_v41  ;;  %v2875_v41 = vld [vmem:[%s4020_s1 + $0x130] ss:$8 sps:$4 sm:$0xff]  }
  0x35   : > { %685 = vmatpush2.bf16.msra.mxu0 %v2812_v42  ;;  %v2880_v42 = vld [vmem:[%s4020_s1 + $0x24] ss:$8 sps:$4 sm:$0xff]  }
  0x36   : > { %726 = vmatpush2.bf16.msra.mxu1 %v2813_v43  ;;  %686 = vmatprep.subr.bf16.mxu0 %v2814_v44  ;;  %v2883_v43 = vld [vmem:[%s4020_s1 + $0x124] ss:$8 sps:$4 sm:$0xff]   ;;  %v2878_v44 = vld [vmem:[%s4020_s1 + $0x20] ss:$8 sps:$4 sm:$0xff]  }
  0x37   : > { %727 = vmatprep.subr.bf16.mxu1 %v2816_v45  ;;  %v2881_v45 = vld [vmem:[%s4020_s1 + $0x120] ss:$8 sps:$4 sm:$0xff]  }
  0x39   : > { %687 = vmatpush2.bf16.msra.mxu0 %v2818_v46  ;;  %v2886_v46 = vld [vmem:[%s4020_s1 + $0x14] ss:$8 sps:$4 sm:$0xff]  }
  0x3a   : > { %728 = vmatpush2.bf16.msra.mxu1 %v2819_v50  ;;  %688 = vmatprep.subr.bf16.mxu0 %v2820_v51  ;;  %v3476_v50 = vld [vmem:[%s3327_s30] sm:$0x11]  ;;  %v3479_v51 = vld [vmem:[%s3327_s30 + $0x8] sm:$0x11] }
  0x3b   : > { %729 = vmatprep.subr.bf16.mxu1 %v2822_v53  ;;  %v2403_v53 = vcombine.high %v3476_v50, %v3476_v50  ;;  %v2405_v55 = vcombine.high %v3479_v51, %v3479_v51 }
  0x3d   : > { %689 = vmatpush2.bf16.msra.mxu0 %v2824_v59  ;;  %v2901_v59 = vld [vmem:[%s4020_s1 + $0x1f4] ss:$8 sps:$4 sm:$0xff]  }
  0x3e   : > { %730 = vmatpush2.bf16.msra.mxu1 %v2825_v60  ;;  %690 = vmatprep.subr.bf16.mxu0 %v2826_v62  ;;  %v2896_v60 = vld [vmem:[%s4020_s1 + $0xf0] ss:$8 sps:$4 sm:$0xff]   ;;  %v2904_v62 = vld [vmem:[%s4020_s1 + $0xe4] ss:$8 sps:$4 sm:$0xff]  }
  0x3f   : > { %731 = vmatprep.subr.bf16.mxu1 %v2828_v63  ;;  %v2907_v63 = vld [vmem:[%s4020_s1 + $0x1e4] ss:$8 sps:$4 sm:$0xff]  }
  0x41   : > { %691 = vmatpush2.bf16.msra.mxu0 %v2830_v4  ;;  %v2908_v4 = vld [vmem:[%s4020_s1 + $0xd0] ss:$8 sps:$4 sm:$0xff]  }
  0x42   : > { %732 = vmatpush2.bf16.msra.mxu1 %v2831_v5  ;;  %692 = vmatprep.subr.bf16.mxu0 %v2832_v6  ;;  %v2911_v5 = vld [vmem:[%s4020_s1 + $0x1d0] ss:$8 sps:$4 sm:$0xff]   ;;  %v2916_v6 = vld [vmem:[%s4020_s1 + $0xc4] ss:$8 sps:$4 sm:$0xff]  }
  0x43   : > { %733 = vmatprep.subr.bf16.mxu1 %v2834_v7  ;;  %v2919_v7 = vld [vmem:[%s4020_s1 + $0x1c4] ss:$8 sps:$4 sm:$0xff]  }
  0x45   : > { %693 = vmatpush2.bf16.msra.mxu0 %v2836_v10  ;;  %v2922_v10 = vld [vmem:[%s4020_s1 + $0xb4] ss:$8 sps:$4 sm:$0xff]  }
  0x46   : > { %734 = vmatpush2.bf16.msra.mxu1 %v2837_v11  ;;  %694 = vmatprep.subr.bf16.mxu0 %v2838_v12  ;;  %v2925_v11 = vld [vmem:[%s4020_s1 + $0x1b4] ss:$8 sps:$4 sm:$0xff]   ;;  %v2920_v12 = vld [vmem:[%s4020_s1 + $0xb0] ss:$8 sps:$4 sm:$0xff]  }
  0x47   : > { %735 = vmatprep.subr.bf16.mxu1 %v2840_v13  ;;  %v2923_v13 = vld [vmem:[%s4020_s1 + $0x1b0] ss:$8 sps:$4 sm:$0xff]  }
  0x49   : > { %695 = vmatpush2.bf16.msra.mxu0 %v2842_v18  ;;  %v2934_v18 = vld [vmem:[%s4020_s1 + $0x94] ss:$8 sps:$4 sm:$0xff]  }
  0x4a   : > { %736 = vmatpush2.bf16.msra.mxu1 %v2843_v19  ;;  %1080 = vmatprep.subr.bf16.mxu0 %v2850_v20  ;;  %v2937_v19 = vld [vmem:[%s4020_s1 + $0x194] ss:$8 sps:$4 sm:$0xff]   ;;  %v2932_v20 = vld [vmem:[%s4020_s1 + $0x90] ss:$8 sps:$4 sm:$0xff]  }
  0x4b   : > { %1121 = vmatprep.subr.bf16.mxu1 %v2853_v21  ;;  %v2935_v21 = vld [vmem:[%s4020_s1 + $0x190] ss:$8 sps:$4 sm:$0xff]  }
  0x4c   : > { %697 = vmatmul.mubr.bf16.vlgmr.msra.gmra.mxu0 %v318_v22  ;;  %v2940_v22 = vld [vmem:[%s4020_s1 + $0x84] ss:$8 sps:$4 sm:$0xff]  }
  0x4d   : > { %738 = vmatmul.mubr.bf16.vlgmr.msra.gmra.mxu1 %v332_v23  ;;  %1081 = vmatpush1.bf16.msra.mxu0 %v2848_v24  ;;  %v2943_v23 = vld [vmem:[%s4020_s1 + $0x184] ss:$8 sps:$4 sm:$0xff]   ;;  %v2938_v24 = vld [vmem:[%s4020_s1 + $0x80] ss:$8 sps:$4 sm:$0xff]  }
  0x4e   : > { %1122 = vmatpush1.bf16.msra.mxu1 %v2851_v25  ;;  %1082 = vmatprep.subr.bf16.mxu0 %v2856_v26  ;;  %v2941_v25 = vld [vmem:[%s4020_s1 + $0x180] ss:$8 sps:$4 sm:$0xff]   ;;  %v2950_v26 = vld [vmem:[%s4020_s1 + $0x474] ss:$8 sps:$4 sm:$0xff]  }
  0x4f   : > { %1123 = vmatprep.subr.bf16.mxu1 %v2859_v27  ;;  %1112 = vmatprep.mubr.bf16.mxu0 %v2403_v53  ;;  %v2953_v27 = vld [vmem:[%s4020_s1 + $0x574] ss:$8 sps:$4 sm:$0xff]   ;;  %v2975_v53 = vld [vmem:[%s4020_s1 + $0x530] ss:$8 sps:$4 sm:$0xff]  }
  0x50   : > { %1153 = vmatprep.mubr.bf16.mxu1 %v2405_v55  ;;  %v2983_v55 = vld [vmem:[%s4020_s1 + $0x524] ss:$8 sps:$4 sm:$0xff]  }
  0x51   : > { %1083 = vmatpush1.bf16.msra.mxu0 %v2854_v28  ;;  %v2402_v28 = vcombine.low %v3476_v50, %v3476_v50  ;;  %v2974_v50 = vld [vmem:[%s4020_s1 + $0x434] ss:$8 sps:$4 sm:$0xff]  }
  0x52   : > { %1124 = vmatpush1.bf16.msra.mxu1 %v2857_v29  ;;  %1084 = vmatprep.subr.bf16.mxu0 %v2862_v30  ;;  %v2404_v29 = vcombine.low %v3479_v51, %v3479_v51  ;;  %v2948_v30 = vld [vmem:[%s4020_s1 + $0x470] ss:$8 sps:$4 sm:$0xff]   ;;  %v2977_v51 = vld [vmem:[%s4020_s1 + $0x534] ss:$8 sps:$4 sm:$0xff]  }
  0x53   : > { %1125 = vmatprep.subr.bf16.mxu1 %v2865_v31  ;;  %v2951_v31 = vld [vmem:[%s4020_s1 + $0x570] ss:$8 sps:$4 sm:$0xff]  }
  0x55   : > { %1085 = vmatpush1.bf16.msra.mxu0 %v2860_v32  ;;  %v2956_v32 = vld [vmem:[%s4020_s1 + $0x464] ss:$8 sps:$4 sm:$0xff]  }
  0x56   : > { %1126 = vmatpush1.bf16.msra.mxu1 %v2863_v33  ;;  %1086 = vmatprep.subr.bf16.mxu0 %v2868_v34  ;;  %v2959_v33 = vld [vmem:[%s4020_s1 + $0x564] ss:$8 sps:$4 sm:$0xff]   ;;  %v2954_v34 = vld [vmem:[%s4020_s1 + $0x460] ss:$8 sps:$4 sm:$0xff]  }
  0x57   : > { %1127 = vmatprep.subr.bf16.mxu1 %v2871_v35  ;;  %v3619_v35 = vld [vmem:[%s3327_s30] sm:$0x22] }
  0x59   : > { %1087 = vmatpush1.bf16.msra.mxu0 %v2866_v36  ;;  %v2535_v36 = vcombine.high %v3619_v35, %v3619_v35 }
  0x5a   : > { %1128 = vmatpush1.bf16.msra.mxu1 %v2869_v37  ;;  %1088 = vmatprep.subr.bf16.mxu0 %v2874_v38  ;;  %v3624_v37 = vld [vmem:[%s3327_s30 + $0x8] sm:$0x22] }
  0x5b   : > { %1129 = vmatprep.subr.bf16.mxu1 %v2877_v39  ;;  %v2957_v38 = vld [vmem:[%s4020_s1 + $0x560] ss:$8 sps:$4 sm:$0xff]   ;;  %v2962_v39 = vld [vmem:[%s4020_s1 + $0x454] ss:$8 sps:$4 sm:$0xff]  }
  0x5d   : > { %1089 = vmatpush1.bf16.msra.mxu0 %v2872_v40  ;;  %v2537_v40 = vcombine.high %v3624_v37, %v3624_v37 }
  0x5e   : > { %1130 = vmatpush1.bf16.msra.mxu1 %v2875_v41  ;;  %1090 = vmatprep.subr.bf16.mxu0 %v2880_v42  ;;  %v2965_v41 = vld [vmem:[%s4020_s1 + $0x554] ss:$8 sps:$4 sm:$0xff]   ;;  %v1240_v42 = vrot.slane %v2535_v36, 1  ;;  %v3043_v36 = vld [vmem:[%s4020_s1 + $0x584] ss:$8 sps:$4 sm:$0xff]  }
  0x5f   : > { %1131 = vmatprep.subr.bf16.mxu1 %v2883_v43  ;;  %v1242_v43 = vrot.slane %v2537_v40, 1 }
  0x61   : > { %1091 = vmatpush1.bf16.msra.mxu0 %v2878_v44  ;;  %v2960_v44 = vld [vmem:[%s4020_s1 + $0x450] ss:$8 sps:$4 sm:$0xff]  }
  0x62   : > { %1132 = vmatpush1.bf16.msra.mxu1 %v2881_v45  ;;  %1092 = vmatprep.subr.bf16.mxu0 %v2886_v46  ;;  %v2963_v45 = vld [vmem:[%s4020_s1 + $0x550] ss:$8 sps:$4 sm:$0xff]   ;;  %v2968_v46 = vld [vmem:[%s4020_s1 + $0x444] ss:$8 sps:$4 sm:$0xff]  }
  0x63   : > { %1133 = vmatprep.subr.bf16.mxu1 %v2889_v47  ;;  %v2971_v47 = vld [vmem:[%s4020_s1 + $0x544] ss:$8 sps:$4 sm:$0xff]  }
  0x65   : > { %1093 = vmatpush1.bf16.msra.mxu0 %v2884_v48  ;;  %v2966_v48 = vld [vmem:[%s4020_s1 + $0x440] ss:$8 sps:$4 sm:$0xff]  }
  0x66   : > { %1134 = vmatpush1.bf16.msra.mxu1 %v2887_v49  ;;  %1094 = vmatprep.subr.bf16.mxu0 %v2892_v52  ;;  %v2969_v49 = vld [vmem:[%s4020_s1 + $0x540] ss:$8 sps:$4 sm:$0xff]   ;;  %v2972_v52 = vld [vmem:[%s4020_s1 + $0x430] ss:$8 sps:$4 sm:$0xff]  }
  0x67   : > { %1135 = vmatprep.subr.bf16.mxu1 %v2895_v54  ;;  %v2980_v54 = vld [vmem:[%s4020_s1 + $0x424] ss:$8 sps:$4 sm:$0xff]  }
  0x69   : > { %1095 = vmatpush1.bf16.msra.mxu0 %v2890_v56  ;;  %v2978_v56 = vld [vmem:[%s4020_s1 + $0x420] ss:$8 sps:$4 sm:$0xff]  }
  0x6a   : > { %1136 = vmatpush1.bf16.msra.mxu1 %v2893_v57  ;;  %1096 = vmatprep.subr.bf16.mxu0 %v2898_v58  ;;  %v2981_v57 = vld [vmem:[%s4020_s1 + $0x520] ss:$8 sps:$4 sm:$0xff]   ;;  %v2986_v58 = vld [vmem:[%s4020_s1 + $0x414] ss:$8 sps:$4 sm:$0xff]  }
  0x6b   : > { %1137 = vmatprep.subr.bf16.mxu1 %v2901_v59  ;;  %v2989_v59 = vld [vmem:[%s4020_s1 + $0x514] ss:$8 sps:$4 sm:$0xff]  }
  0x6d   : > { %1097 = vmatpush2.bf16.msra.mxu0 %v2896_v60  ;;  %v2984_v60 = vld [vmem:[%s4020_s1 + $0x410] ss:$8 sps:$4 sm:$0xff]  }
  0x6e   : > { %1138 = vmatpush2.bf16.msra.mxu1 %v2899_v61  ;;  %1098 = vmatprep.subr.bf16.mxu0 %v2904_v62  ;;  %v2987_v61 = vld [vmem:[%s4020_s1 + $0x510] ss:$8 sps:$4 sm:$0xff]   ;;  %v2992_v62 = vld [vmem:[%s4020_s1 + $0x404] ss:$8 sps:$4 sm:$0xff]  }
  0x6f   : > { %1139 = vmatprep.subr.bf16.mxu1 %v2907_v63  ;;  %v2995_v63 = vld [vmem:[%s4020_s1 + $0x504] ss:$8 sps:$4 sm:$0xff]  }
  0x71   : > { %1099 = vmatpush2.bf16.msra.mxu0 %v2902_v0  ;;  %v2990_v0 = vld [vmem:[%s4020_s1 + $0x400] ss:$8 sps:$4 sm:$0xff]  }
  0x72   : > { %1140 = vmatpush2.bf16.msra.mxu1 %v2905_v1  ;;  %1100 = vmatprep.subr.bf16.mxu0 %v2910_v2  ;;  %v2993_v1 = vld [vmem:[%s4020_s1 + $0x500] ss:$8 sps:$4 sm:$0xff]   ;;  %v2998_v2 = vld [vmem:[%s4020_s1 + $0x4f4] ss:$8 sps:$4 sm:$0xff]  }
  0x73   : > { %1141 = vmatprep.subr.bf16.mxu1 %v2913_v3  ;;  %v3001_v3 = vld [vmem:[%s4020_s1 + $0x5f4] ss:$8 sps:$4 sm:$0xff]  }
  0x75   : > { %1101 = vmatpush2.bf16.msra.mxu0 %v2908_v4  ;;  %v2996_v4 = vld [vmem:[%s4020_s1 + $0x4f0] ss:$8 sps:$4 sm:$0xff]  }
  0x76   : > { %1142 = vmatpush2.bf16.msra.mxu1 %v2911_v5  ;;  %1102 = vmatprep.subr.bf16.mxu0 %v2916_v6  ;;  %v2999_v5 = vld [vmem:[%s4020_s1 + $0x5f0] ss:$8 sps:$4 sm:$0xff]   ;;  %v3004_v6 = vld [vmem:[%s4020_s1 + $0x4e4] ss:$8 sps:$4 sm:$0xff]  }
  0x77   : > { %1143 = vmatprep.subr.bf16.mxu1 %v2919_v7  ;;  %v3007_v7 = vld [vmem:[%s4020_s1 + $0x5e4] ss:$8 sps:$4 sm:$0xff]  }
  0x79   : > { %1103 = vmatpush2.bf16.msra.mxu0 %v2914_v8  ;;  %v3002_v8 = vld [vmem:[%s4020_s1 + $0x4e0] ss:$8 sps:$4 sm:$0xff]  }
  0x7a   : > { %1144 = vmatpush2.bf16.msra.mxu1 %v2917_v9  ;;  %1104 = vmatprep.subr.bf16.mxu0 %v2922_v10  ;;  %v3005_v9 = vld [vmem:[%s4020_s1 + $0x5e0] ss:$8 sps:$4 sm:$0xff]   ;;  %v3010_v10 = vld [vmem:[%s4020_s1 + $0x4d4] ss:$8 sps:$4 sm:$0xff]  }
  0x7b   : > { %1145 = vmatprep.subr.bf16.mxu1 %v2925_v11  ;;  %v3013_v11 = vld [vmem:[%s4020_s1 + $0x5d4] ss:$8 sps:$4 sm:$0xff]  }
  0x7d   : > { %1105 = vmatpush2.bf16.msra.mxu0 %v2920_v12  ;;  %v3008_v12 = vld [vmem:[%s4020_s1 + $0x4d0] ss:$8 sps:$4 sm:$0xff]  }
  0x7e   : > { %1146 = vmatpush2.bf16.msra.mxu1 %v2923_v13  ;;  %1106 = vmatprep.subr.bf16.mxu0 %v2928_v14  ;;  %v3011_v13 = vld [vmem:[%s4020_s1 + $0x5d0] ss:$8 sps:$4 sm:$0xff]   ;;  %v3016_v14 = vld [vmem:[%s4020_s1 + $0x4c4] ss:$8 sps:$4 sm:$0xff]  }
  0x7f   : > { %1147 = vmatprep.subr.bf16.mxu1 %v2931_v15  ;;  %v3019_v15 = vld [vmem:[%s4020_s1 + $0x5c4] ss:$8 sps:$4 sm:$0xff]  }
  0x81   : > { %1107 = vmatpush2.bf16.msra.mxu0 %v2926_v16  ;;  %v3014_v16 = vld [vmem:[%s4020_s1 + $0x4c0] ss:$8 sps:$4 sm:$0xff]  }
  0x82   : > { %1148 = vmatpush2.bf16.msra.mxu1 %v2929_v17  ;;  %1108 = vmatprep.subr.bf16.mxu0 %v2934_v18  ;;  %v3017_v17 = vld [vmem:[%s4020_s1 + $0x5c0] ss:$8 sps:$4 sm:$0xff]   ;;  %v3022_v18 = vld [vmem:[%s4020_s1 + $0x4b4] ss:$8 sps:$4 sm:$0xff]  }
  0x83   : > { %1149 = vmatprep.subr.bf16.mxu1 %v2937_v19  ;;  %v3025_v19 = vld [vmem:[%s4020_s1 + $0x5b4] ss:$8 sps:$4 sm:$0xff]  }
  0x85   : > { %1109 = vmatpush2.bf16.msra.mxu0 %v2932_v20  ;;  %v3020_v20 = vld [vmem:[%s4020_s1 + $0x4b0] ss:$8 sps:$4 sm:$0xff]  }
  0x86   : > { %1150 = vmatpush2.bf16.msra.mxu1 %v2935_v21  ;;  %1110 = vmatprep.subr.bf16.mxu0 %v2940_v22  ;;  %v3023_v21 = vld [vmem:[%s4020_s1 + $0x5b0] ss:$8 sps:$4 sm:$0xff]   ;;  %v3028_v22 = vld [vmem:[%s4020_s1 + $0x4a4] ss:$8 sps:$4 sm:$0xff]  }
  0x87   : > { %1151 = vmatprep.subr.bf16.mxu1 %v2943_v23  ;;  %v3031_v23 = vld [vmem:[%s4020_s1 + $0x5a4] ss:$8 sps:$4 sm:$0xff]  }
  0x89   : > { %1111 = vmatpush2.bf16.msra.mxu0 %v2938_v24  ;;  %v3770_v24 = vld [vmem:[%s3327_s30] sm:$0x66] }
  0x8a   : > { %1152 = vmatpush2.bf16.msra.mxu1 %v2941_v25  ;;  %1567 = vmatprep.subr.bf16.mxu0 %v2950_v26  ;;  %v3773_v25 = vld [vmem:[%s3327_s30 + $0x8] sm:$0x66] }
  0x8b   : > { %1608 = vmatprep.subr.bf16.mxu1 %v2953_v27  ;;  %v3026_v26 = vld [vmem:[%s4020_s1 + $0x4a0] ss:$8 sps:$4 sm:$0xff]  }
  0x8c   : > { %1113 = vmatmul.mubr.bf16.vlgmr.msra.gmra.mxu0 %v2402_v28  ;;  %v3029_v27 = vld [vmem:[%s4020_s1 + $0x5a0] ss:$8 sps:$4 sm:$0xff]   ;;  %v3034_v28 = vld [vmem:[%s4020_s1 + $0x494] ss:$8 sps:$4 sm:$0xff]  }
  0x8d   : > { %1154 = vmatmul.mubr.bf16.vlgmr.msra.gmra.mxu1 %v2404_v29  ;;  %1568 = vmatpush1.bf16.msra.mxu0 %v2948_v30  ;;  %v3037_v29 = vld [vmem:[%s4020_s1 + $0x594] ss:$8 sps:$4 sm:$0xff]   ;;  %v2667_v30 = vcombine.high %v3770_v24, %v3770_v24 }
  0x8e   : > { %1609 = vmatpush1.bf16.msra.mxu1 %v2951_v31  ;;  %1569 = vmatprep.subr.bf16.mxu0 %v2956_v32  ;;  %v2669_v31 = vcombine.high %v3773_v25, %v3773_v25  ;;  %v3032_v32 = vld [vmem:[%s4020_s1 + $0x490] ss:$8 sps:$4 sm:$0xff]  }
  0x8f   : > { %1610 = vmatprep.subr.bf16.mxu1 %v2959_v33  ;;  %1599 = vmatprep.mubr.bf16.mxu0 %v1240_v42  ;;  %v3035_v33 = vld [vmem:[%s4020_s1 + $0x590] ss:$8 sps:$4 sm:$0xff]   ;;  %v2534_v42 = vcombine.low %v3619_v35, %v3619_v35  ;;  %v3053_v35 = vld [vmem:[%s4020_s1 + $0x774] ss:$8 sps:$4 sm:$0xff]  }
  0x90   : > { %1640 = vmatprep.mubr.bf16.mxu1 %v1242_v43  ;;  %v1753_v40 = vshrl.u32 %v2669_v31, 16  ;;  %v2536_v43 = vcombine.low %v3624_v37, %v3624_v37 }
  0x91   : > { %1570 = vmatpush1.bf16.msra.mxu0 %v2954_v34  ;;  %v3040_v34 = vld [vmem:[%s4020_s1 + $0x484] ss:$8 sps:$4 sm:$0xff]  }
  0x92   : > { %1611 = vmatpush1.bf16.msra.mxu1 %v2957_v38  ;;  %1571 = vmatprep.subr.bf16.mxu0 %v2962_v39  ;;  %v1737_v38 = vshrl.u32 %v2667_v30, 16  ;;  %v1740_v39 = vshll.u32 %v2667_v30, 16  ;;  %v3110_v30 = vld [vmem:[%s4020_s1 + $0x6d4] ss:$8 sps:$4 sm:$0xff]  }
  0x93   : > { %1612 = vmatprep.subr.bf16.mxu1 %v2965_v41  ;;  %v1756_v41 = vshll.u32 %v2669_v31, 16  ;;  %v3113_v31 = vld [vmem:[%s4020_s1 + $0x7d4] ss:$8 sps:$4 sm:$0xff]  }
  0x94   : > { %v1739_v37 = vrot.slane %v1737_v38, 1  ;;  %v3114_v38 = vld [vmem:[%s4020_s1 + $0x6c0] ss:$8 sps:$4 sm:$0xff]  }
  0x95   : > { %1572 = vmatpush1.bf16.msra.mxu0 %v2960_v44  ;;  %v3038_v44 = vld [vmem:[%s4020_s1 + $0x480] ss:$8 sps:$4 sm:$0xff]  }
  0x96   : > { %1613 = vmatpush1.bf16.msra.mxu1 %v2963_v45  ;;  %1573 = vmatprep.subr.bf16.mxu0 %v2968_v46  ;;  %v3041_v45 = vld [vmem:[%s4020_s1 + $0x580] ss:$8 sps:$4 sm:$0xff]   ;;  %v3050_v46 = vld [vmem:[%s4020_s1 + $0x674] ss:$8 sps:$4 sm:$0xff]  }
  0x97   : > { %1614 = vmatprep.subr.bf16.mxu1 %v2971_v47  ;;  %v1742_v47 = vrot.slane %v1740_v39, 2  ;;  %v3117_v39 = vld [vmem:[%s4020_s1 + $0x7c0] ss:$8 sps:$4 sm:$0xff]  }
  0x99   : > { %1574 = vmatpush1.bf16.msra.mxu0 %v2966_v48  ;;  %v1755_v48 = vrot.slane %v1753_v40, 1  ;;  %v3122_v40 = vld [vmem:[%s4020_s1 + $0x6b4] ss:$8 sps:$4 sm:$0xff]  }
  0x9a   : > { %1615 = vmatpush1.bf16.msra.mxu1 %v2969_v49  ;;  %1575 = vmatprep.subr.bf16.mxu0 %v2974_v50  ;;  %v1758_v49 = vrot.slane %v1756_v41, 2  ;;  %v1239_v50 = vrot.slane %v2534_v42, 1  ;;  %v3125_v41 = vld [vmem:[%s4020_s1 + $0x7b4] ss:$8 sps:$4 sm:$0xff]   ;;  %v3120_v42 = vld [vmem:[%s4020_s1 + $0x6b0] ss:$8 sps:$4 sm:$0xff]  }
  0x9b   : > { %1616 = vmatprep.subr.bf16.mxu1 %v2977_v51  ;;  %v1241_v51 = vrot.slane %v2536_v43, 1  ;;  %v3123_v43 = vld [vmem:[%s4020_s1 + $0x7b0] ss:$8 sps:$4 sm:$0xff]  }
  0x9d   : > { %1576 = vmatpush1.bf16.msra.mxu0 %v2972_v52  ;;  %v3048_v52 = vld [vmem:[%s4020_s1 + $0x670] ss:$8 sps:$4 sm:$0xff]  }
  0x9e   : > { %1617 = vmatpush1.bf16.msra.mxu1 %v2975_v53  ;;  %1577 = vmatprep.subr.bf16.mxu0 %v2980_v54  ;;  %v3051_v53 = vld [vmem:[%s4020_s1 + $0x770] ss:$8 sps:$4 sm:$0xff]   ;;  %v3056_v54 = vld [vmem:[%s4020_s1 + $0x664] ss:$8 sps:$4 sm:$0xff]  }
  0x9f   : > { %1618 = vmatprep.subr.bf16.mxu1 %v2983_v55  ;;  %v3059_v55 = vld [vmem:[%s4020_s1 + $0x764] ss:$8 sps:$4 sm:$0xff]  }
  0xa1   : > { %1578 = vmatpush1.bf16.msra.mxu0 %v2978_v56  ;;  %v1743_v56 = vor.u32 %v1742_v47, %v1739_v37  ;;  %v3126_v37 = vld [vmem:[%s4020_s1 + $0x6a0] ss:$8 sps:$4 sm:$0xff]  }
  0xa2   : > { %1619 = vmatpush1.bf16.msra.mxu1 %v2981_v57  ;;  %1579 = vmatprep.subr.bf16.mxu0 %v2986_v58  ;;  %v1759_v57 = vor.u32 %v1758_v49, %v1755_v48  ;;  %v3054_v58 = vld [vmem:[%s4020_s1 + $0x660] ss:$8 sps:$4 sm:$0xff]   ;;  %v3134_v48 = vld [vmem:[%s4020_s1 + $0x694] ss:$8 sps:$4 sm:$0xff]  }
  0xa3   : > { %1620 = vmatprep.subr.bf16.mxu1 %v2989_v59  ;;  %v3057_v59 = vld [vmem:[%s4020_s1 + $0x760] ss:$8 sps:$4 sm:$0xff]  }
  0xa4   : > { %v3129_v47 = vld [vmem:[%s4020_s1 + $0x7a0] ss:$8 sps:$4 sm:$0xff]  }
  0xa5   : > { %1580 = vmatpush1.bf16.msra.mxu0 %v2984_v60  ;;  %v3062_v60 = vld [vmem:[%s4020_s1 + $0x654] ss:$8 sps:$4 sm:$0xff]  }
  0xa6   : > { %1621 = vmatpush1.bf16.msra.mxu1 %v2987_v61  ;;  %1581 = vmatprep.subr.bf16.mxu0 %v2992_v62  ;;  %v3065_v61 = vld [vmem:[%s4020_s1 + $0x754] ss:$8 sps:$4 sm:$0xff]   ;;  %v3060_v62 = vld [vmem:[%s4020_s1 + $0x650] ss:$8 sps:$4 sm:$0xff]  }
  0xa7   : > { %1622 = vmatprep.subr.bf16.mxu1 %v2995_v63  ;;  %v3063_v63 = vld [vmem:[%s4020_s1 + $0x750] ss:$8 sps:$4 sm:$0xff]  }
  0xa9   : > { %1582 = vmatpush1.bf16.msra.mxu0 %v2990_v0  ;;  %v3068_v0 = vld [vmem:[%s4020_s1 + $0x644] ss:$8 sps:$4 sm:$0xff]  }
  0xaa   : > { %1623 = vmatpush1.bf16.msra.mxu1 %v2993_v1  ;;  %1583 = vmatprep.subr.bf16.mxu0 %v2998_v2  ;;  %v3071_v1 = vld [vmem:[%s4020_s1 + $0x744] ss:$8 sps:$4 sm:$0xff]   ;;  %v3066_v2 = vld [vmem:[%s4020_s1 + $0x640] ss:$8 sps:$4 sm:$0xff]  }
  0xab   : > { %1624 = vmatprep.subr.bf16.mxu1 %v3001_v3  ;;  %v3069_v3 = vld [vmem:[%s4020_s1 + $0x740] ss:$8 sps:$4 sm:$0xff]  }
  0xad   : > { %1584 = vmatpush2.bf16.msra.mxu0 %v2996_v4  ;;  %v3074_v4 = vld [vmem:[%s4020_s1 + $0x634] ss:$8 sps:$4 sm:$0xff]  }
  0xae   : > { %1625 = vmatpush2.bf16.msra.mxu1 %v2999_v5  ;;  %1585 = vmatprep.subr.bf16.mxu0 %v3004_v6  ;;  %v3077_v5 = vld [vmem:[%s4020_s1 + $0x734] ss:$8 sps:$4 sm:$0xff]   ;;  %v3072_v6 = vld [vmem:[%s4020_s1 + $0x630] ss:$8 sps:$4 sm:$0xff]  }
  0xaf   : > { %1626 = vmatprep.subr.bf16.mxu1 %v3007_v7  ;;  %v3075_v7 = vld [vmem:[%s4020_s1 + $0x730] ss:$8 sps:$4 sm:$0xff]  }
  0xb1   : > { %1586 = vmatpush2.bf16.msra.mxu0 %v3002_v8  ;;  %v3080_v8 = vld [vmem:[%s4020_s1 + $0x624] ss:$8 sps:$4 sm:$0xff]  }
  0xb2   : > { %1627 = vmatpush2.bf16.msra.mxu1 %v3005_v9  ;;  %1587 = vmatprep.subr.bf16.mxu0 %v3010_v10  ;;  %v3083_v9 = vld [vmem:[%s4020_s1 + $0x724] ss:$8 sps:$4 sm:$0xff]   ;;  %v3078_v10 = vld [vmem:[%s4020_s1 + $0x620] ss:$8 sps:$4 sm:$0xff]  }
  0xb3   : > { %1628 = vmatprep.subr.bf16.mxu1 %v3013_v11  ;;  %v3081_v11 = vld [vmem:[%s4020_s1 + $0x720] ss:$8 sps:$4 sm:$0xff]  }
  0xb5   : > { %1588 = vmatpush2.bf16.msra.mxu0 %v3008_v12  ;;  %v3086_v12 = vld [vmem:[%s4020_s1 + $0x614] ss:$8 sps:$4 sm:$0xff]  }
  0xb6   : > { %1629 = vmatpush2.bf16.msra.mxu1 %v3011_v13  ;;  %1589 = vmatprep.subr.bf16.mxu0 %v3016_v14  ;;  %v3089_v13 = vld [vmem:[%s4020_s1 + $0x714] ss:$8 sps:$4 sm:$0xff]   ;;  %v3084_v14 = vld [vmem:[%s4020_s1 + $0x610] ss:$8 sps:$4 sm:$0xff]  }
  0xb7   : > { %1630 = vmatprep.subr.bf16.mxu1 %v3019_v15  ;;  %v3087_v15 = vld [vmem:[%s4020_s1 + $0x710] ss:$8 sps:$4 sm:$0xff]  }
  0xb9   : > { %1590 = vmatpush2.bf16.msra.mxu0 %v3014_v16  ;;  %v3092_v16 = vld [vmem:[%s4020_s1 + $0x604] ss:$8 sps:$4 sm:$0xff]  }
  0xba   : > { %1631 = vmatpush2.bf16.msra.mxu1 %v3017_v17  ;;  %1591 = vmatprep.subr.bf16.mxu0 %v3022_v18  ;;  %v3095_v17 = vld [vmem:[%s4020_s1 + $0x704] ss:$8 sps:$4 sm:$0xff]   ;;  %v3090_v18 = vld [vmem:[%s4020_s1 + $0x600] ss:$8 sps:$4 sm:$0xff]  }
  0xbb   : > { %1632 = vmatprep.subr.bf16.mxu1 %v3025_v19  ;;  %v3093_v19 = vld [vmem:[%s4020_s1 + $0x700] ss:$8 sps:$4 sm:$0xff]  }
  0xbd   : > { %1592 = vmatpush2.bf16.msra.mxu0 %v3020_v20  ;;  %v3098_v20 = vld [vmem:[%s4020_s1 + $0x6f4] ss:$8 sps:$4 sm:$0xff]  }
  0xbe   : > { %1633 = vmatpush2.bf16.msra.mxu1 %v3023_v21  ;;  %1593 = vmatprep.subr.bf16.mxu0 %v3028_v22  ;;  %v3101_v21 = vld [vmem:[%s4020_s1 + $0x7f4] ss:$8 sps:$4 sm:$0xff]   ;;  %v3096_v22 = vld [vmem:[%s4020_s1 + $0x6f0] ss:$8 sps:$4 sm:$0xff]  }
  0xbf   : > { %1634 = vmatprep.subr.bf16.mxu1 %v3031_v23  ;;  %v3099_v23 = vld [vmem:[%s4020_s1 + $0x7f0] ss:$8 sps:$4 sm:$0xff]  }
  0xc1   : > { %1594 = vmatpush2.bf16.msra.mxu0 %v3026_v26  ;;  %v3104_v26 = vld [vmem:[%s4020_s1 + $0x6e4] ss:$8 sps:$4 sm:$0xff]  }
  0xc2   : > { %1635 = vmatpush2.bf16.msra.mxu1 %v3029_v27  ;;  %1595 = vmatprep.subr.bf16.mxu0 %v3034_v28  ;;  %v3107_v27 = vld [vmem:[%s4020_s1 + $0x7e4] ss:$8 sps:$4 sm:$0xff]   ;;  %v3102_v28 = vld [vmem:[%s4020_s1 + $0x6e0] ss:$8 sps:$4 sm:$0xff]  }
  0xc3   : > { %1636 = vmatprep.subr.bf16.mxu1 %v3037_v29  ;;  %v3105_v29 = vld [vmem:[%s4020_s1 + $0x7e0] ss:$8 sps:$4 sm:$0xff]  }
  0xc5   : > { %1596 = vmatpush2.bf16.msra.mxu0 %v3032_v32  ;;  %v3108_v32 = vld [vmem:[%s4020_s1 + $0x6d0] ss:$8 sps:$4 sm:$0xff]  }
  0xc6   : > { %1637 = vmatpush2.bf16.msra.mxu1 %v3035_v33  ;;  %1597 = vmatprep.subr.bf16.mxu0 %v3040_v34  ;;  %v3111_v33 = vld [vmem:[%s4020_s1 + $0x7d0] ss:$8 sps:$4 sm:$0xff]   ;;  %v3116_v34 = vld [vmem:[%s4020_s1 + $0x6c4] ss:$8 sps:$4 sm:$0xff]  }
  0xc7   : > { %1638 = vmatprep.subr.bf16.mxu1 %v3043_v36  ;;  %v3119_v36 = vld [vmem:[%s4020_s1 + $0x7c4] ss:$8 sps:$4 sm:$0xff]  }
  0xc9   : > { %1598 = vmatpush2.bf16.msra.mxu0 %v3038_v44  ;;  %v3128_v44 = vld [vmem:[%s4020_s1 + $0x6a4] ss:$8 sps:$4 sm:$0xff]  }
  0xca   : > { %1639 = vmatpush2.bf16.msra.mxu1 %v3041_v45  ;;  %2084 = vmatprep.subr.bf16.mxu0 %v3050_v46  ;;  %v3131_v45 = vld [vmem:[%s4020_s1 + $0x7a4] ss:$8 sps:$4 sm:$0xff]   ;;  %v2666_v46 = vcombine.low %v3770_v24, %v3770_v24  ;;  %v3137_v24 = vld [vmem:[%s4020_s1 + $0x794] ss:$8 sps:$4 sm:$0xff]  }
  0xcb   : > { %2125 = vmatprep.subr.bf16.mxu1 %v3053_v35  ;;  %v2668_v35 = vcombine.low %v3773_v25, %v3773_v25 }
  0xcc   : > { %1600 = vmatmul.mubr.bf16.vlgmr.msra.gmra.mxu0 %v1239_v50  ;;  %v1729_v25 = vshrl.u32 %v2666_v46, 16  ;;  %v1732_v49 = vshll.u32 %v2666_v46, 16 }
  0xcd   : > { %1641 = vmatmul.mubr.bf16.vlgmr.msra.gmra.mxu1 %v1241_v51  ;;  %2085 = vmatpush1.bf16.msra.mxu0 %v3048_v52  ;;  %v1745_v50 = vshrl.u32 %v2668_v35, 16  ;;  %v1748_v51 = vshll.u32 %v2668_v35, 16  ;;  %v3132_v52 = vld [vmem:[%s4020_s1 + $0x690] ss:$8 sps:$4 sm:$0xff]  }
  0xce   : > { %2126 = vmatpush1.bf16.msra.mxu1 %v3051_v53  ;;  %2086 = vmatprep.subr.bf16.mxu0 %v3056_v54  ;;  %v3135_v53 = vld [vmem:[%s4020_s1 + $0x790] ss:$8 sps:$4 sm:$0xff]   ;;  %v3140_v54 = vld [vmem:[%s4020_s1 + $0x684] ss:$8 sps:$4 sm:$0xff]  }
  0xcf   : > { %2127 = vmatprep.subr.bf16.mxu1 %v3059_v55  ;;  %2116 = vmatprep.mubr.bf16.mxu0 %v1743_v56  ;;  %v3143_v55 = vld [vmem:[%s4020_s1 + $0x784] ss:$8 sps:$4 sm:$0xff]   ;;  %v1731_v56 = vrot.slane %v1729_v25, 1 }
  0xd0   : > { %2157 = vmatprep.mubr.bf16.mxu1 %v1759_v57  ;;  %v1734_v57 = vrot.slane %v1732_v49, 2 }
  0xd1   : > { %2087 = vmatpush1.bf16.msra.mxu0 %v3054_v58  ;;  %v1747_v58 = vrot.slane %v1745_v50, 1 }
  0xd2   : > { %2128 = vmatpush1.bf16.msra.mxu1 %v3057_v59  ;;  %2088 = vmatprep.subr.bf16.mxu0 %v3062_v60  ;;  %v1750_v59 = vrot.slane %v1748_v51, 2  ;;  %v3138_v60 = vld [vmem:[%s4020_s1 + $0x680] ss:$8 sps:$4 sm:$0xff]  }
  0xd3   : > { %2129 = vmatprep.subr.bf16.mxu1 %v3065_v61  ;;  %v3141_v61 = vld [vmem:[%s4020_s1 + $0x780] ss:$8 sps:$4 sm:$0xff]  }
  0xd5   : > { %2089 = vmatpush1.bf16.msra.mxu0 %v3060_v62  ;;  %v1735_v62 = vor.u32 %v1734_v57, %v1731_v56 }
  0xd6   : > { %2130 = vmatpush1.bf16.msra.mxu1 %v3063_v63  ;;  %2090 = vmatprep.subr.bf16.mxu0 %v3068_v0  ;;  %v1751_v63 = vor.u32 %v1750_v59, %v1747_v58 }
  0xd7   : > { %2131 = vmatprep.subr.bf16.mxu1 %v3071_v1 }
  0xd9   : > { %2091 = vmatpush1.bf16.msra.mxu0 %v3066_v2 }
  0xda   : > { %2132 = vmatpush1.bf16.msra.mxu1 %v3069_v3  ;;  %2092 = vmatprep.subr.bf16.mxu0 %v3074_v4 }
  0xdb   : > { %2133 = vmatprep.subr.bf16.mxu1 %v3077_v5 }
  0xdd   : > { %2093 = vmatpush1.bf16.msra.mxu0 %v3072_v6 }
  0xde   : > { %2134 = vmatpush1.bf16.msra.mxu1 %v3075_v7  ;;  %2094 = vmatprep.subr.bf16.mxu0 %v3080_v8 }
  0xdf   : > { %2135 = vmatprep.subr.bf16.mxu1 %v3083_v9 }
  0xe1   : > { %2095 = vmatpush1.bf16.msra.mxu0 %v3078_v10 }
  0xe2   : > { %2136 = vmatpush1.bf16.msra.mxu1 %v3081_v11  ;;  %2096 = vmatprep.subr.bf16.mxu0 %v3086_v12 }
  0xe3   : > { %2137 = vmatprep.subr.bf16.mxu1 %v3089_v13 }
  0xe5   : > { %2097 = vmatpush1.bf16.msra.mxu0 %v3084_v14 }
  0xe6   : > { %2138 = vmatpush1.bf16.msra.mxu1 %v3087_v15  ;;  %2098 = vmatprep.subr.bf16.mxu0 %v3092_v16 }
  0xe7   : > { %2139 = vmatprep.subr.bf16.mxu1 %v3095_v17 }
  0xe9   : > { %2099 = vmatpush1.bf16.msra.mxu0 %v3090_v18 }
  0xea   : > { %2140 = vmatpush1.bf16.msra.mxu1 %v3093_v19  ;;  %2100 = vmatprep.subr.bf16.mxu0 %v3098_v20 }
  0xeb   : > { %2141 = vmatprep.subr.bf16.mxu1 %v3101_v21 }
  0xed   : > { %2101 = vmatpush2.bf16.msra.mxu0 %v3096_v22 }
  0xee   : > { %2142 = vmatpush2.bf16.msra.mxu1 %v3099_v23  ;;  %2102 = vmatprep.subr.bf16.mxu0 %v3104_v26 }
  0xef   : > { %2143 = vmatprep.subr.bf16.mxu1 %v3107_v27 }
  0xf1   : > { %2103 = vmatpush2.bf16.msra.mxu0 %v3102_v28 }
  0xf2   : > { %2144 = vmatpush2.bf16.msra.mxu1 %v3105_v29  ;;  %2104 = vmatprep.subr.bf16.mxu0 %v3110_v30 }
  0xf3   : > { %2145 = vmatprep.subr.bf16.mxu1 %v3113_v31 }
  0xf5   : > { %2105 = vmatpush2.bf16.msra.mxu0 %v3108_v32 }
  0xf6   : > { %2146 = vmatpush2.bf16.msra.mxu1 %v3111_v33  ;;  %2106 = vmatprep.subr.bf16.mxu0 %v3116_v34  ;;  %v2170_v34 = vlaneseq }
  0xf7   : > { %2147 = vmatprep.subr.bf16.mxu1 %v3119_v36 }
  0xf8   : > { %v2171_v36 = vshrl.u32 %v2170_v34, 7 }
  0xf9   : > { %2107 = vmatpush2.bf16.msra.mxu0 %v3114_v38 }
  0xfa   : > { %2148 = vmatpush2.bf16.msra.mxu1 %v3117_v39  ;;  %2108 = vmatprep.subr.bf16.mxu0 %v3122_v40  ;;  %v2172_v38 = vsub.s32 0, %v2171_v36  ;;  %v2168_v39 = vld [vmem:[%s4021_s2] sm:$0x3] }
  0xfb   : > { %2149 = vmatprep.subr.bf16.mxu1 %v3125_v41  ;;  %v2176_v41 = vsub.s32 1, %v2171_v36 }
  0xfd   : > { %2109 = vmatpush2.bf16.msra.mxu0 %v3120_v42  ;;  %v2177_v49 = vrot.slane %v2168_v39, %v2176_v41 }
  0xfe   : > { %2150 = vmatpush2.bf16.msra.mxu1 %v3123_v43  ;;  %2110 = vmatprep.subr.bf16.mxu0 %v3128_v44 }
  0xff   : > { %2151 = vmatprep.subr.bf16.mxu1 %v3131_v45  ;;  %v2173_v45 = vrot.slane %v2168_v39, %v2172_v38 }
 0x101   : > { %2111 = vmatpush2.bf16.msra.mxu0 %v3126_v37  ;;  %v3156_v37 = vmov 1966171168  }
 0x102   : > { %2152 = vmatpush2.bf16.msra.mxu1 %v3129_v47  ;;  %2112 = vmatprep.subr.bf16.mxu0 %v3134_v48  ;;  %v2194_v47 = vunpack.c.l.s4 %v3156_v37 }
 0x103   : > { %2153 = vmatprep.subr.bf16.mxu1 %v3137_v24 }
 0x105   : > { %2113 = vmatpush2.bf16.msra.mxu0 %v3132_v52 }
 0x106   : > { %2154 = vmatpush2.bf16.msra.mxu1 %v3135_v53  ;;  %2114 = vmatprep.subr.bf16.mxu0 %v3140_v54  ;;  %v2195_v54 = vunpack.c.0.s8 %v2194_v47 }
 0x107   : > { %2155 = vmatprep.subr.bf16.mxu1 %v3143_v55 }
 0x109   : > { %2115 = vmatpush2.bf16.msra.mxu0 %v3138_v60  ;;  %v2198_v60 = vsub.s32 %v2195_v54, %v2171_v36 }
 0x10a   : > { %2156 = vmatpush2.bf16.msra.mxu1 %v3141_v61 }
 0x10c   : > { %v698_v0 = vpop.f32.mrf.mxu0  ;;  %2117 = vmatmul.mubr.bf16.vlgmr.msra.gmra.mxu0 %v1735_v62 }
 0x10d   : > { %v739_v1 = vpop.f32.mrf.mxu1  ;;  %2158 = vmatmul.mubr.bf16.vlgmr.msra.gmra.mxu1 %v1751_v63 }
 0x10e   : > { %v740_v2 = vadd.f32 %v739_v1, %v698_v0  ;;  %v700_v3 = vpop.f32.mrf.mxu0 }
 0x10f   : > { %v741_v4 = vpop.f32.mrf.mxu1 }
 0x110   : > { %v742_v5 = vadd.f32 %v741_v4, %v700_v3  ;;  %v702_v6 = vpop.f32.mrf.mxu0 }
 0x111   : > { %v743_v7 = vpop.f32.mrf.mxu1 }
 0x112   : > { %v703_v8 = vpop.f32.mrf.mxu0 }
 0x113   : > { %v744_v9 = vpop.f32.mrf.mxu1 }
 0x14c   : > { %v1114_v10 = vpop.f32.mrf.mxu0 }
 0x14d   : > { %v1155_v11 = vpop.f32.mrf.mxu1  ;;  %v1115_v12 = vadd.f32 %v1114_v10, %v740_v2 }
 0x14e   : > { %v1116_v13 = vpop.f32.mrf.mxu0 }
 0x14f   : > { %v1157_v14 = vpop.f32.mrf.mxu1  ;;  %v1156_v15 = vadd.f32 %v1155_v11, %v1115_v12  ;;  %v1117_v16 = vadd.f32 %v1116_v13, %v742_v5 }
 0x150   : > { %v1118_v17 = vpop.f32.mrf.mxu0 }
 0x151   : > { %v1159_v18 = vpop.f32.mrf.mxu1  ;;  %v1158_v19 = vadd.f32 %v1157_v14, %v1117_v16 }
 0x152   : > { %v1119_v20 = vpop.f32.mrf.mxu0 }
 0x153   : > { %v1160_v21 = vpop.f32.mrf.mxu1 }
 0x18c   : > { %v1601_v22 = vpop.f32.mrf.mxu0 }
 0x18d   : > { %v1642_v23 = vpop.f32.mrf.mxu1 }
 0x18e   : > { %v1643_v26 = vadd.f32 %v1642_v23, %v1601_v22  ;;  %v1603_v27 = vpop.f32.mrf.mxu0 }
 0x18f   : > { %v1644_v28 = vpop.f32.mrf.mxu1 }
 0x190   : > { %v1649_v29 = vadd.f32 %v1643_v26, %v1156_v15  ;;  %v1605_v30 = vpop.f32.mrf.mxu0  ;;  %v1645_v40 = vadd.f32 %v1644_v28, %v1603_v27 }
 0x191   : > { %v1646_v31 = vpop.f32.mrf.mxu1 }
 0x192   : > { %v1606_v32 = vpop.f32.mrf.mxu0  ;;  %v1650_v48 = vadd.f32 %v1645_v40, %v1158_v19 }
 0x193   : > { %v1647_v33 = vpop.f32.mrf.mxu1 }
 0x1cc   : > { %v2118_v42 = vpop.f32.mrf.mxu0 }
 0x1cd   : > { %v2159_v43 = vpop.f32.mrf.mxu1 }
 0x1ce   : > { %v2160_v44 = vadd.f32 %v2159_v43, %v2118_v42  ;;  %v2120_v46 = vpop.f32.mrf.mxu0 }
 0x1cf   : > { %v2161_v35 = vpop.f32.mrf.mxu1 }
 0x1d0   : > { %v2166_v24 = vadd.f32 %v2160_v44, %v1649_v29  ;;  %v2162_v25 = vadd.f32 %v2161_v35, %v2120_v46  ;;  %v2122_v50 = vpop.f32.mrf.mxu0 }
 0x1d1   : > { %v2163_v51 = vpop.f32.mrf.mxu1 }
 0x1d2   : > { %v2180_v52 = vadd.f32 %v2173_v45, %v2166_v24  ;;  %v2167_v53 = vadd.f32 %v2162_v25, %v1650_v48  ;;  %v2123_v55 = vpop.f32.mrf.mxu0 }
 0x1d3   : > { %v2164_v56 = vpop.f32.mrf.mxu1 }
 0x1d4   : > { %v2184_v57 = vmul.f32 0.2, %v2180_v52  ;;  %v2181_v58 = vadd.f32 %v2177_v49, %v2167_v53  ;;  %vm2182_vm0 = vcmp.gt.f32.partialorder %v2180_v52, 0.0 }
 0x1d6   : > { %vm2183_vm1 = vcmp.gt.f32.partialorder %v2181_v58, 0.0  ;;  %v2185_v59 = vmul.f32 0.2, %v2181_v58  ;;  %v2186_v61 = vsel %vm2182_vm0, %v2180_v52, %v2184_v57 }
 0x1d8   : > { %v2187_v62 = vsel %vm2183_vm1, %v2181_v58, %v2185_v59 }
 0x1d9   : > { %v2734_v63 = vpack.c.bf16 %v2187_v62, %v2186_v61 }
 0x1db   : > { %v2199_v0 = vrot.slane %v2734_v63, %v2198_v60 }
 0x1dd   : > { %2735 = vst.sshfl [vmem:[%s168_s21] sm:$0x5 pattern:$0x73625140] %v2199_v0 }
 0x1de PF: > { %s13_s12 = sadd.s32 1, %s3154_s12  }
 0x1df   : > { %p10_p4 = scmp.ge.s32.totalorder %s13_s12, 4  }
 0x1e1   :  { %12 = sbr.rel (!%p10_p4) target bundleno = 1 (0x1), region = 65 }

</bundles_post_ra>
